<compile_context>
chip_gen: v6e
topology: v6e:2x2x1
jax: 0.10.0
libtpu: 0.0.40
codegen_flags: <defaults>
</compile_context>

<pallas_src>
import jax
import jax.numpy as jnp
from jax.experimental import pallas as pl
from jax.experimental.pallas import tpu as pltpu

# ---- model hyperparameters (match the PyTorch module) ----------------------
FEATURES = 32          # `features`
NUM_EMB = 4            # `num_embeddings`
EMB_SIZE = 10          # `embedding_size` (hard-coded in __init__)
SIGMA = 0.3
GAMMA = 0.99           # only used by update_embeddings (not forward)
ZW = EMB_SIZE * NUM_EMB                     # 40 "real" z columns
NEG_INV_TWO_SIGMA_SQ = -1.0 / (2.0 * SIGMA * SIGMA)

# weight-slab layout (lane offsets are multiples of 128 -> aligned slices)
_W2_OFF, _W3_OFF, _WE_OFF, _GRP_OFF = 0, 128, 256, 384
_WSLAB_SHAPE = (128, 512)                   # f32, 256 KiB
_RSLAB_SHAPE = (8, 128)                     # f32, 4 KiB


def _model_kernel(x_ref, wmat_ref, rows_ref, out_ref):
    x = x_ref[...]                                          # (TM, 2)

    # row slab: w1 rows, biases, flattened embeddings, y lane mask
    w1r0 = rows_ref[0:1, 0:FEATURES]                        # (1, F)
    w1r1 = rows_ref[1:2, 0:FEATURES]
    b1 = rows_ref[2:3, 0:FEATURES]
    b2 = rows_ref[3:4, 0:FEATURES]
    b3 = rows_ref[4:5, 0:FEATURES]
    emb = rows_ref[5:6, :]                                  # (1, 128), 0 past col 40
    ymask = rows_ref[6:7, :]                                # (1, 128), 1.0 at lanes 40..43

    # weight slab: each region starts on a 128-lane boundary
    w2 = wmat_ref[0:FEATURES, _W2_OFF:_W2_OFF + FEATURES]            # (F, F)
    w3 = wmat_ref[0:FEATURES, _W3_OFF:_W3_OFF + FEATURES]            # (F, F)
    we = wmat_ref[0:FEATURES, _WE_OFF:_WE_OFF + 128]                 # (F, 128), 0 past 40
    grp = wmat_ref[:, _GRP_OFF:_GRP_OFF + 128]                       # (128, 128), cols 40..43

    # fc1: contraction dim of 2 -> two VPU broadcast-FMAs (skip the MXU)
    h = jnp.maximum(x[:, 0:1] * w1r0 + x[:, 1:2] * w1r1 + b1, 0.0)   # (TM, F)
    # fc2 -> relu
    h = jnp.maximum(jnp.dot(h, w2, preferred_element_type=jnp.float32) + b2, 0.0)
    # fc3 (no activation)
    h = jnp.dot(h, w3, preferred_element_type=jnp.float32) + b3
    # einsum('ij,mnj->imn') as (TM, F) @ (F, 128-padded E*NE); cols 40: are 0
    zp = jnp.dot(h, we, preferred_element_type=jnp.float32)          # (TM, 128)

    # bilinear RBF head: mean over embedding_size axis via grouping matmul.
    # grp's nonzero columns are 40..43, so mean_sq lands NEXT to z's 40 cols.
    diff = zp - emb
    sq = diff * diff
    mean_sq = jnp.dot(sq, grp, preferred_element_type=jnp.float32)   # (TM, 128)
    # merged slab: lanes 0..39 = z, lanes 40..43 = y_pred, rest = 0.
    # ymask gates the exp term so exp(0)=1 never leaks into other lanes.
    merged = zp + ymask * jnp.exp(mean_sq * NEG_INV_TWO_SIGMA_SQ)
    out_ref[...] = merged.astype(out_ref.dtype)                      # one dense 128-lane store


def _choose_tm(B):
    """Batch tile: 512-1024 for large B, but keep >=2 tiles so v7x's 2 TCs are busy."""
    half = -(-B // 2)                         # cdiv(B, 2)
    tm = ((half + 255) // 256) * 256          # round up to a multiple of 256
    return max(256, min(1024, tm))


def model_bilinear_forward(x, packed_params, *, tm=None,
                           out_dtype=jnp.float32, return_padded=False):
    """Fused forward pass.

    x: (B, 2) f32.  Returns (z (B,E,NE), y_pred (B,NE)) — or, if
    return_padded=True, the raw merged (B_pad, 128) slab (lanes 0..39 = z,
    40..43 = y_pred) so a fused consumer can skip the wrapper slice pass.
    out_dtype=jnp.bfloat16 halves store bytes (useful on v5e) at ~1e-3 rel err.
    """
    wslab, rslab = packed_params
    B = x.shape[0]
    if tm is None:
        tm = _choose_tm(B)
    num_tiles = pl.cdiv(B, tm)
    b_pad = num_tiles * tm
    if b_pad != B:
        x = jnp.pad(x, ((0, b_pad - B), (0, 0)))

    out_bytes = b_pad * 128 * jnp.dtype(out_dtype).itemsize
    cost = pl.CostEstimate(
        flops=2 * b_pad * (2 * FEATURES + 2 * FEATURES * FEATURES
                           + FEATURES * 128 + 128 * 128),
        transcendentals=b_pad,                       # ~4 real exps/row, one vreg pass
        bytes_accessed=(4 * (b_pad * 2
                             + _WSLAB_SHAPE[0] * _WSLAB_SHAPE[1]
                             + _RSLAB_SHAPE[0] * _RSLAB_SHAPE[1])
                        + out_bytes),                # single merged output
    )

    merged = pl.pallas_call(
        _model_kernel,
        out_shape=jax.ShapeDtypeStruct((b_pad, 128), out_dtype),
        grid=(num_tiles,),
        in_specs=[
            pl.BlockSpec((tm, 2), lambda i: (i, 0)),                 # batch tile of x
            pl.BlockSpec(_WSLAB_SHAPE, lambda i: (0, 0),
                         pipeline_mode=pl.Buffered(1)),              # resident weight slab
            pl.BlockSpec(_RSLAB_SHAPE, lambda i: (0, 0),
                         pipeline_mode=pl.Buffered(1)),              # resident row slab
        ],
        out_specs=pl.BlockSpec((tm, 128), lambda i: (i, 0)),
        compiler_params=pltpu.CompilerParams(
            dimension_semantics=("parallel",)),
        cost_estimate=cost,
    )(x, wslab, rslab)

    if return_padded:
        return merged
    # TODO(synk): fuse these slices into the consumer (loss / grad-penalty) to
    # avoid re-reading the padded slab from HBM in a separate XLA pass.
    z = merged[:B, :ZW].astype(jnp.float32).reshape(B, EMB_SIZE, NUM_EMB)
    y_pred = merged[:B, ZW:ZW + NUM_EMB].astype(jnp.float32)
    return z, y_pred


def init_params(key):
    """Deterministic init mirroring the PyTorch module's shapes.

    Returns (packed_slabs_for_kernel, raw_params_for_reference).
    """
    ks = jax.random.split(key, 8)
    # nn.Linear(2, F) applied as x @ W.T -> store (2, F) directly.
    w1 = jax.random.normal(ks[0], (2, FEATURES), jnp.float32) * 0.5
    b1 = jax.random.normal(ks[1], (FEATURES,), jnp.float32) * 0.1
    w2 = jax.random.normal(ks[2], (FEATURES, FEATURES), jnp.float32) * 0.2
    b2 = jax.random.normal(ks[3], (FEATURES,), jnp.float32) * 0.1
    w3 = jax.random.normal(ks[4], (FEATURES, FEATURES), jnp.float32) * 0.2
    b3 = jax.random.normal(ks[5], (FEATURES,), jnp.float32) * 0.1
    # W: (embedding_size, num_embeddings, features) ~ N(0, 1)
    W = jax.random.normal(ks[6], (EMB_SIZE, NUM_EMB, FEATURES), jnp.float32)
    # buffers: N = 20 * ones(NE); m = N(0,1) * N -> embeddings = m / N
    N_buf = jnp.ones((NUM_EMB,), jnp.float32) * 20.0
    m_buf = jax.random.normal(ks[7], (EMB_SIZE, NUM_EMB), jnp.float32) * N_buf[None, :]
    embeddings = m_buf / N_buf[None, :]                      # (E, NE)

    # ---- pack kernel slabs --------------------------------------------------
    w_emb_flat = W.reshape(ZW, FEATURES).T                   # (F, E*NE)
    emb_flat = embeddings.reshape(ZW)                        # (E*NE,)
    # grouping matrix: G[m*NE + n, n] = 1/E  (mean over embedding_size axis)
    group = jnp.tile(jnp.eye(NUM_EMB, dtype=jnp.float32),
                     (EMB_SIZE, 1)) / float(EMB_SIZE)        # (E*NE, NE)

    wslab = jnp.zeros(_WSLAB_SHAPE, jnp.float32)
    wslab = wslab.at[:FEATURES, _W2_OFF:_W2_OFF + FEATURES].set(w2)
    wslab = wslab.at[:FEATURES, _W3_OFF:_W3_OFF + FEATURES].set(w3)
    wslab = wslab.at[:FEATURES, _WE_OFF:_WE_OFF + ZW].set(w_emb_flat)
    # grouping columns shifted to lanes 40..43 so y lands next to z's 40 cols
    wslab = wslab.at[:ZW, _GRP_OFF + ZW:_GRP_OFF + ZW + NUM_EMB].set(group)

    rslab = jnp.zeros(_RSLAB_SHAPE, jnp.float32)
    rslab = rslab.at[0, 0:FEATURES].set(w1[0])
    rslab = rslab.at[1, 0:FEATURES].set(w1[1])
    rslab = rslab.at[2, 0:FEATURES].set(b1)
    rslab = rslab.at[3, 0:FEATURES].set(b2)
    rslab = rslab.at[4, 0:FEATURES].set(b3)
    rslab = rslab.at[5, 0:ZW].set(emb_flat)
    rslab = rslab.at[6, ZW:ZW + NUM_EMB].set(1.0)            # y lane mask (lanes 40..43)

    packed = (wslab, rslab)
    raw = (w1, b1, w2, b2, w3, b3, W, embeddings)
    return packed, raw


def reference_forward(x, raw):
    """Plain-JAX reference (mirrors the PyTorch forward) for sanity checking."""
    (w1, b1, w2, b2, w3, b3, W, embeddings) = raw
    h = jnp.maximum(x @ w1 + b1[None, :], 0.0)
    h = jnp.maximum(h @ w2 + b2[None, :], 0.0)
    h = h @ w3 + b3[None, :]
    z = jnp.einsum('ij,mnj->imn', h, W)                      # (B, E, NE)
    diff = z - embeddings[None, :, :]
    y = jnp.exp(jnp.mean(-diff ** 2, axis=1) / (2.0 * SIGMA ** 2))
    return z, y


if __name__ == "__main__":
    key = jax.random.PRNGKey(0)
    k_x, k_p = jax.random.split(key)
    B = 512                                   # -> tm=256, 2 parallel batch tiles
    x = jax.random.normal(k_x, (B, 2), jnp.float32)
    packed, raw = init_params(k_p)

    z, y_pred = model_bilinear_forward(x, packed)
    jax.block_until_ready((z, y_pred))

    z_ref, y_ref = reference_forward(x, raw)
    assert z.shape == (B, EMB_SIZE, NUM_EMB)
    assert y_pred.shape == (B, NUM_EMB)
    assert jnp.allclose(z, z_ref, atol=1e-4, rtol=1e-4)
    assert jnp.allclose(y_pred, y_ref, atol=1e-4, rtol=1e-4)

    print("KERNEL_OK")
</pallas_src>

<mosaic_0001>
module attributes {stable_mosaic.version = 11 : i64} {
  func.func @_model_kernel(%arg0: i32, %arg1: memref<256x2xf32, #tpu.memory_space<vmem>>, %arg2: memref<128x512xf32, #tpu.memory_space<vmem>>, %arg3: memref<8x128xf32, #tpu.memory_space<vmem>>, %arg4: memref<256x128xf32, #tpu.memory_space<vmem>>) attributes {dimension_semantics = [#tpu.dimension_semantics<parallel>], iteration_bounds = array<i64: 2>, scalar_prefetch = 0 : i64, scratch_operands = 0 : i64, tpu.core_type = #tpu.core_type<tc>, window_params = [{transform_indices = @transform_0, window_bounds = array<i64: 256, 2>}, {pipeline_mode = #tpu.pipeline_mode<synchronous>, transform_indices = @transform_1, window_bounds = array<i64: 128, 512>}, {pipeline_mode = #tpu.pipeline_mode<synchronous>, transform_indices = @transform_2, window_bounds = array<i64: 8, 128>}, {transform_indices = @transform_3, window_bounds = array<i64: 256, 128>}]} {
    %c0 = arith.constant 0 : index
    %c0_0 = arith.constant 0 : index
    %0 = vector.load %arg1[%c0, %c0_0] : memref<256x2xf32, #tpu.memory_space<vmem>>, vector<256x2xf32>
    %c0_1 = arith.constant 0 : index
    %c0_2 = arith.constant 0 : index
    %1 = vector.load %arg3[%c0_1, %c0_2] : memref<8x128xf32, #tpu.memory_space<vmem>>, vector<1x32xf32>
    %c1 = arith.constant 1 : index
    %c0_3 = arith.constant 0 : index
    %2 = vector.load %arg3[%c1, %c0_3] : memref<8x128xf32, #tpu.memory_space<vmem>>, vector<1x32xf32>
    %c2 = arith.constant 2 : index
    %c0_4 = arith.constant 0 : index
    %3 = vector.load %arg3[%c2, %c0_4] : memref<8x128xf32, #tpu.memory_space<vmem>>, vector<1x32xf32>
    %c3 = arith.constant 3 : index
    %c0_5 = arith.constant 0 : index
    %4 = vector.load %arg3[%c3, %c0_5] : memref<8x128xf32, #tpu.memory_space<vmem>>, vector<1x32xf32>
    %c4 = arith.constant 4 : index
    %c0_6 = arith.constant 0 : index
    %5 = vector.load %arg3[%c4, %c0_6] : memref<8x128xf32, #tpu.memory_space<vmem>>, vector<1x32xf32>
    %c5 = arith.constant 5 : index
    %c0_7 = arith.constant 0 : index
    %6 = vector.load %arg3[%c5, %c0_7] : memref<8x128xf32, #tpu.memory_space<vmem>>, vector<1x128xf32>
    %c6 = arith.constant 6 : index
    %c0_8 = arith.constant 0 : index
    %7 = vector.load %arg3[%c6, %c0_8] : memref<8x128xf32, #tpu.memory_space<vmem>>, vector<1x128xf32>
    %c0_9 = arith.constant 0 : index
    %c0_10 = arith.constant 0 : index
    %8 = vector.load %arg2[%c0_9, %c0_10] : memref<128x512xf32, #tpu.memory_space<vmem>>, vector<32x32xf32>
    %c0_11 = arith.constant 0 : index
    %c128 = arith.constant 128 : index
    %9 = vector.load %arg2[%c0_11, %c128] : memref<128x512xf32, #tpu.memory_space<vmem>>, vector<32x32xf32>
    %c0_12 = arith.constant 0 : index
    %c256 = arith.constant 256 : index
    %10 = vector.load %arg2[%c0_12, %c256] : memref<128x512xf32, #tpu.memory_space<vmem>>, vector<32x128xf32>
    %c0_13 = arith.constant 0 : index
    %c384 = arith.constant 384 : index
    %11 = vector.load %arg2[%c0_13, %c384] : memref<128x512xf32, #tpu.memory_space<vmem>>, vector<128x128xf32>
    %12 = vector.extract_strided_slice %0 {offsets = [0, 0], sizes = [256, 1], strides = [1, 1]} : vector<256x2xf32> to vector<256x1xf32>
    %13 = vector.broadcast %12 : vector<256x1xf32> to vector<256x32xf32>
    %14 = vector.broadcast %1 : vector<1x32xf32> to vector<256x32xf32>
    %15 = arith.mulf %13, %14 : vector<256x32xf32>
    %16 = vector.extract_strided_slice %0 {offsets = [0, 1], sizes = [256, 1], strides = [1, 1]} : vector<256x2xf32> to vector<256x1xf32>
    %17 = vector.broadcast %16 : vector<256x1xf32> to vector<256x32xf32>
    %18 = vector.broadcast %2 : vector<1x32xf32> to vector<256x32xf32>
    %19 = arith.mulf %17, %18 : vector<256x32xf32>
    %20 = arith.addf %15, %19 : vector<256x32xf32>
    %21 = vector.broadcast %3 : vector<1x32xf32> to vector<256x32xf32>
    %22 = arith.addf %20, %21 : vector<256x32xf32>
    %cst = arith.constant 0.000000e+00 : f32
    %23 = vector.broadcast %cst : f32 to vector<256x32xf32>
    %24 = arith.maximumf %22, %23 : vector<256x32xf32>
    %cst_14 = arith.constant dense<0.000000e+00> : vector<256x32xf32>
    %25 = tpu.matmul %24, %8, %cst_14 {dimension_numbers = #tpu.dot_dimension_numbers<[1], [0], [0], [1], [0, 0, 1, 1], [], []>} : vector<256x32xf32>, vector<32x32xf32>, vector<256x32xf32> -> vector<256x32xf32>
    %26 = vector.broadcast %4 : vector<1x32xf32> to vector<256x32xf32>
    %27 = arith.addf %25, %26 : vector<256x32xf32>
    %cst_15 = arith.constant 0.000000e+00 : f32
    %28 = vector.broadcast %cst_15 : f32 to vector<256x32xf32>
    %29 = arith.maximumf %27, %28 : vector<256x32xf32>
    %cst_16 = arith.constant dense<0.000000e+00> : vector<256x32xf32>
    %30 = tpu.matmul %29, %9, %cst_16 {dimension_numbers = #tpu.dot_dimension_numbers<[1], [0], [0], [1], [0, 0, 1, 1], [], []>} : vector<256x32xf32>, vector<32x32xf32>, vector<256x32xf32> -> vector<256x32xf32>
    %31 = vector.broadcast %5 : vector<1x32xf32> to vector<256x32xf32>
    %32 = arith.addf %30, %31 : vector<256x32xf32>
    %cst_17 = arith.constant dense<0.000000e+00> : vector<256x128xf32>
    %33 = tpu.matmul %32, %10, %cst_17 {dimension_numbers = #tpu.dot_dimension_numbers<[1], [0], [0], [1], [0, 0, 1, 1], [], []>} : vector<256x32xf32>, vector<32x128xf32>, vector<256x128xf32> -> vector<256x128xf32>
    %34 = vector.broadcast %6 : vector<1x128xf32> to vector<256x128xf32>
    %35 = arith.subf %33, %34 : vector<256x128xf32>
    %36 = arith.mulf %35, %35 : vector<256x128xf32>
    %cst_18 = arith.constant dense<0.000000e+00> : vector<256x128xf32>
    %37 = tpu.matmul %36, %11, %cst_18 {dimension_numbers = #tpu.dot_dimension_numbers<[1], [0], [0], [1], [0, 0, 1, 1], [], []>} : vector<256x128xf32>, vector<128x128xf32>, vector<256x128xf32> -> vector<256x128xf32>
    %cst_19 = arith.constant -5.55555534 : f32
    %38 = vector.broadcast %cst_19 : f32 to vector<256x128xf32>
    %39 = arith.mulf %37, %38 : vector<256x128xf32>
    %40 = math.exp %39 : vector<256x128xf32>
    %41 = vector.broadcast %7 : vector<1x128xf32> to vector<256x128xf32>
    %42 = arith.mulf %41, %40 : vector<256x128xf32>
    %43 = arith.addf %33, %42 : vector<256x128xf32>
    %c0_20 = arith.constant 0 : index
    %c0_21 = arith.constant 0 : index
    %44 = vector.load %arg4[%c0_20, %c0_21] : memref<256x128xf32, #tpu.memory_space<vmem>>, vector<256x128xf32>
    tpu.vector_store %arg4[%c0_20, %c0_21], %43 {strides = array<i32>} : memref<256x128xf32, #tpu.memory_space<vmem>>, vector<256x128xf32>,
    return
  }
  func.func @transform_0(%arg0: i32) -> (i32, i32) {
    %c0_i32 = arith.constant 0 : i32
    %c0_i32_0 = arith.constant 0 : i32
    return %arg0, %c0_i32 : i32, i32
  }
  func.func @transform_1(%arg0: i32) -> (i32, i32) {
    %c0_i32 = arith.constant 0 : i32
    %c0_i32_0 = arith.constant 0 : i32
    %c0_i32_1 = arith.constant 0 : i32
    return %c0_i32, %c0_i32_0 : i32, i32
  }
  func.func @transform_2(%arg0: i32) -> (i32, i32) {
    %c0_i32 = arith.constant 0 : i32
    %c0_i32_0 = arith.constant 0 : i32
    %c0_i32_1 = arith.constant 0 : i32
    return %c0_i32, %c0_i32_0 : i32, i32
  }
  func.func @transform_3(%arg0: i32) -> (i32, i32) {
    %c0_i32 = arith.constant 0 : i32
    %c0_i32_0 = arith.constant 0 : i32
    return %arg0, %c0_i32 : i32, i32
  }
}

</mosaic_0001>

<bundles_post_ra>
// kernel: tpu_custom_call.1
= control target key start
LH: loop header
LB: loop body
LE: loop exit
PB: predicated region body
PF: predicated region fallthrough
CT: control target
= control target key end

     0   :  { %8 = vsyncpa [#allocation3], 0  ;;  %s3728_s0 = inlined_call_operand.vmem [shape: f32[512,2], index: 0, kind: input, shape index: {}]   ;;  %s3729_s1 = inlined_call_operand.vmem [shape: f32[128,512], index: 1, kind: input, shape index: {}]   ;;  %s3730_s2 = inlined_call_operand.vmem [shape: f32[8,128], index: 2, kind: input, shape index: {}]   ;;  %s3731_s3 = inlined_call_operand.hbm [shape: f32[512,128], index: 3, kind: output, shape index: {}]  }
   0x1   :  { %10 = vsyncpa [#allocation3 + $0x1], 0  ;;  %s2987_s12 = smov 0   ;;  %s2989_s13 = smov 0  }
   0x2   :  { %s2991_s14 = smov 0   ;;  %s2993_s15 = smov 0  }
   0x3 LB: > { %s3008_s16 = sadd.s32 4294967295, %s2960_s15   ;;  %s2268_s17 = sadd.s32 4294967294, %s2960_s15   ;;  %s2960_s15 = sphi %s2993_s15, %s3737_s15   ;;  %s2956_s14 = sphi %s2991_s14, %s3736_s14   ;;  %s2952_s13 = sphi %s2989_s13, %s3735_s13   ;;  %s2948_s12 = sphi %s2987_s12, %s3734_s12  }
   0x4   : > { %s3012_s18 = sadd.s32 1, %s2960_s15   ;;  %s91_s19 = sadd.s32 1, %s2956_s14 }
   0x5   : > { %s88_s20 = ssub.s32 %s2960_s15, %s3012_s18  ;;  %p101_p0 = scmp.ne.s32.totalorder %s2956_s14, %s2952_s13 }
   0x6   : > { %p89_p1 = scmp.eq.s32.totalorder %s88_s20, 0  ;;  %p102_p2 = scmp.eq.s32.totalorder %s3008_s16, 1 }
   0x7   : > { %p107_p3 = scmp.ne.s32.totalorder %s2952_s13, %s2948_s12  ;;  %p108_p4 = scmp.eq.s32.totalorder %s2268_s17, 1 }
   0x8   : > { %s3023_s21 = scalar_select %p89_p1, %s2956_s14, %s91_s19  }
   0x9   : > { %p3025_p5 = por %p102_p2, %p101_p0  ;;  %p3029_p6 = por %p108_p4, %p107_p3 }
   0xa   : > { %p2271_p7 = scmp.ge.s32.totalorder %s2960_s15, 1  ;;  %p141_p8 = scmp.lt.s32.totalorder %s2960_s15, 3 }
   0xc   : > { %p142_p9 = pnand %p2271_p7, %p141_p8 }
   0xd   : > { %s2273_s24 = sshll.u32 (!%p142_p9), %s3008_s16, 5  ;;  %s2383_s30 = sshll.u32 (!%p142_p9), %s3008_s16, 12 }
   0xe   : > { %145 = sbr.rel (%p142_p9) target bundleno = 1110 (0x456), region = 32  ;;  %p166_p10 = scmp.lt.s32.totalorder (!%p142_p9), %s2273_s24, 63 }
   0xf   : > { %s3679_s7 = scalar_lea.hbm (!%p142_p9), %s3731_s3, %s2383_s30  ;;  %s2964_s9 = smov (!%p142_p9), [#allocation2]  }
  0x10   : > { %s2904_s10 = sshll.u32 (!%p142_p9), %s2964_s9, 4  ;;  %s2905_s10 = int_to_ptr.vmem [resolvable:$false] %s2904_s10 }
  0x11   : > { %s2906_s11 = scalar_lea.vmem (!%p142_p9), %s2905_s10, 8192 }
  0x13   : > { %v2962_v0 = vmov 0   ;;  %s3739_s24 = smov (!%p166_p10, %s2273_s24), 63  ;;  %v2963_v3 = vmov 1   ;;  %v214_v5 = vld [vmem:[%s3729_s1 + $0x60] sm:$0xff]  ;;  %vm703_vm0 = vcmask 261120  }
  0x14   : > { %2833 = vset.pattern.permute.xlu1 %v2962_v0  ;;  %2831 = vset.pattern.permute.xlu0 %v2962_v0  ;;  %s2274_s25 = sshll.u32 %s3739_s24, 3  ;;  %v213_v7 = vld [vmem:[%s3729_s1 + $0x40] sm:$0xff] }
  0x15   : > { %s3039_s28 = scalar_lea.vmem %s3728_s0, %s2274_s25  ;;  %2540 = vmatprep.subr.mxu0 %v214_v5  ;;  %v212_v8 = vld [vmem:[%s3729_s1 + $0x20] sm:$0xff]  ;;  %s162_s25 = sand.u32 1, %s2952_s13  }
  0x16   : > { %v173_v1 = vld [vmem:[%s3039_s28 + $0x8] sm:$0xff]  ;;  %v172_v2 = vld [vmem:[%s3039_s28] sm:$0xff]  ;;  %v174_v4 = vld [vmem:[%s3039_s28 + $0x10] sm:$0xff]  ;;  %2541 = vmatpush3.msra.mxu0 %v214_v5  ;;  %s3688_s16 = scalar_lea.sflag [#allocation3], %s162_s25 }
  0x17   : > { %246 = vperm.xlu1 %2833, %v173_v1   ;;  %241 = vperm.xlu0 %2831, %v172_v2   ;;  %v175_v6 = vld [vmem:[%s3039_s28 + $0x18] sm:$0xff]  ;;  %v211_v9 = vld [vmem:[%s3729_s1] sm:$0xff]  ;;  %v177_v11 = vld [vmem:[%s3039_s28 + $0x28] sm:$0xff] }
  0x18   : > { %2542 = vmatprep.subr.mxu0 %v213_v7  ;;  %v176_v10 = vld [vmem:[%s3039_s28 + $0x20] sm:$0xff]  ;;  %v178_v12 = vld [vmem:[%s3039_s28 + $0x30] sm:$0xff]  ;;  %v179_v13 = vld [vmem:[%s3039_s28 + $0x38] sm:$0xff] }
  0x19   : > { %2543 = vmatpush3.msra.mxu0 %v213_v7  ;;  %v180_v14 = vld [vmem:[%s3039_s28 + $0x40] sm:$0xff]  ;;  %v181_v15 = vld [vmem:[%s3039_s28 + $0x48] sm:$0xff]  ;;  %v182_v16 = vld [vmem:[%s3039_s28 + $0x50] sm:$0xff] }
  0x1a   : > { %2544 = vmatprep.subr.mxu0 %v212_v8  ;;  %v183_v17 = vld [vmem:[%s3039_s28 + $0x58] sm:$0xff]  ;;  %v184_v18 = vld [vmem:[%s3039_s28 + $0x60] sm:$0xff]  ;;  %v185_v19 = vld [vmem:[%s3039_s28 + $0x68] sm:$0xff] }
  0x1b   : > { %2834 = vset.pattern.permute.xlu1 %v2963_v3  ;;  %2832 = vset.pattern.permute.xlu0 %v2963_v3  ;;  %v186_v20 = vld [vmem:[%s3039_s28 + $0x70] sm:$0xff]  ;;  %v187_v21 = vld [vmem:[%s3039_s28 + $0x78] sm:$0xff]  ;;  %v188_v22 = vld [vmem:[%s3039_s28 + $0x80] sm:$0xff] }
  0x1c   : > { %440 = vperm.xlu1 %2834, %v173_v1   ;;  %436 = vperm.xlu0 %2832, %v172_v2   ;;  %v189_v23 = vld [vmem:[%s3039_s28 + $0x88] sm:$0xff]  ;;  %v190_v24 = vld [vmem:[%s3039_s28 + $0x90] sm:$0xff]  ;;  %v191_v25 = vld [vmem:[%s3039_s28 + $0x98] sm:$0xff] }
  0x1d   : > { %2545 = vmatpush3.msra.mxu0 %v212_v8  ;;  %v192_v26 = vld [vmem:[%s3039_s28 + $0xa0] sm:$0xff]  ;;  %v193_v27 = vld [vmem:[%s3039_s28 + $0xa8] sm:$0xff]  ;;  %v194_v28 = vld [vmem:[%s3039_s28 + $0xb0] sm:$0xff] }
  0x1e   : > { %2546 = vmatprep.subr.mxu0 %v211_v9  ;;  %v195_v29 = vld [vmem:[%s3039_s28 + $0xb8] sm:$0xff]  ;;  %v196_v30 = vld [vmem:[%s3039_s28 + $0xc0] sm:$0xff]  ;;  %v197_v31 = vld [vmem:[%s3039_s28 + $0xc8] sm:$0xff] }
  0x1f   : > { %2547 = vmatpush3.msra.mxu0 %v211_v9  ;;  %v198_v32 = vld [vmem:[%s3039_s28 + $0xd0] sm:$0xff]  ;;  %v199_v33 = vld [vmem:[%s3039_s28 + $0xd8] sm:$0xff]  ;;  %v200_v34 = vld [vmem:[%s3039_s28 + $0xe0] sm:$0xff] }
  0x20   : > { %2835 = vset.pattern.permute.xlu1 %v2962_v0  ;;  %444 = vperm.xlu0 %2832, %v174_v4   ;;  %v201_v35 = vld [vmem:[%s3039_s28 + $0xe8] sm:$0xff]  ;;  %v202_v36 = vld [vmem:[%s3039_s28 + $0xf0] sm:$0xff]  ;;  %v203_v37 = vld [vmem:[%s3039_s28 + $0xf8] sm:$0xff]  ;;  %s2272_s28 = sshll.u32 %s162_s25, 8 }
  0x21   : > { %251 = vperm.xlu1 %2835, %v174_v4   ;;  %v3088_v40 = vld [vmem:[%s3730_s2] ss:$0 sm:$0xff]  ;;  %v3093_v41 = vld [vmem:[%s3730_s2 + $0x1] ss:$0 sm:$0xff]  ;;  %v3102_v48 = vld [vmem:[%s3730_s2 + $0x2] ss:$0 sm:$0xff] }
  0x22   : > { %s3582_s29 = scalar_lea.vmem [#allocation2], %s2272_s28 }
  0x23   : > { %s2206_s4 = sshll.u32 %s3582_s29, 4  ;;  %s3681_s4 = int_to_ptr.vmem [resolvable:$true] %s2206_s4 }
  0x24   : > { %448 = vperm.xlu0 %2832, %v175_v6   ;;  %s2900_s8 = scalar_lea.vmem %s3681_s4, 4096  ;;  %p2907_p0 = scmp.lt.s32.totalorder %s3681_s4, %s2905_s10 }
  0x25   : > { %256 = vperm.xlu1 %2835, %v175_v6   ;;  %p2901_p11 = scmp.ne.s32.totalorder %s3681_s4, %s2900_s8  ;;  %p2908_p1 = scmp.lt.s32.totalorder %s2906_s11, %s2900_s8 }
  0x27   : > { %p2902_p12 = pnand %p2901_p11, %p3025_p5  ;;  %p2909_p2 = por %p2908_p1, %p2907_p0 }
  0x28   : > { %452 = vperm.xlu0 %2832, %v176_v10  }
  0x29   : > { %261 = vperm.xlu1 %2835, %v176_v10   ;;  %p2903_p13 = pneg %p2902_p12 }
  0x2b   : > { %p2910_p3 = pnand %p2909_p2, %p2903_p13 }
  0x2c   : > { %456 = vperm.xlu0 %2832, %v177_v11  }
  0x2d   : > { %266 = vperm.xlu1 %2835, %v177_v11  }
  0x30   : > { %460 = vperm.xlu0 %2832, %v178_v12  }
  0x31   : > { %271 = vperm.xlu1 %2835, %v178_v12  }
  0x34   : > { %464 = vperm.xlu0 %2832, %v179_v13  }
  0x35   : > { %276 = vperm.xlu1 %2835, %v179_v13  }
  0x38   : > { %468 = vperm.xlu0 %2832, %v180_v14  }
  0x39   : > { %281 = vperm.xlu1 %2835, %v180_v14  }
  0x3c   : > { %472 = vperm.xlu0 %2832, %v181_v15  }
  0x3d   : > { %286 = vperm.xlu1 %2835, %v181_v15  }
  0x40   : > { %476 = vperm.xlu0 %2832, %v182_v16  }
  0x41   : > { %291 = vperm.xlu1 %2835, %v182_v16  }
  0x44   : > { %480 = vperm.xlu0 %2832, %v183_v17  }
  0x45   : > { %296 = vperm.xlu1 %2835, %v183_v17  }
  0x48   : > { %484 = vperm.xlu0 %2832, %v184_v18  }
  0x49   : > { %301 = vperm.xlu1 %2835, %v184_v18  }
  0x4c   : > { %488 = vperm.xlu0 %2832, %v185_v19  }
  0x4d   : > { %306 = vperm.xlu1 %2835, %v185_v19  }
  0x50   : > { %492 = vperm.xlu0 %2832, %v186_v20  }
  0x51   : > { %311 = vperm.xlu1 %2835, %v186_v20  }
  0x54   : > { %496 = vperm.xlu0 %2832, %v187_v21  }
  0x55   : > { %316 = vperm.xlu1 %2835, %v187_v21  }
  0x58   : > { %500 = vperm.xlu0 %2832, %v188_v22  }
  0x59   : > { %321 = vperm.xlu1 %2835, %v188_v22  }
  0x5c   : > { %504 = vperm.xlu0 %2832, %v189_v23  }
  0x5d   : > { %326 = vperm.xlu1 %2835, %v189_v23  }
  0x60   : > { %508 = vperm.xlu0 %2832, %v190_v24  }
  0x61   : > { %331 = vperm.xlu1 %2835, %v190_v24  }
  0x64   : > { %512 = vperm.xlu0 %2832, %v191_v25  }
  0x65   : > { %336 = vperm.xlu1 %2835, %v191_v25  }
  0x68   : > { %516 = vperm.xlu0 %2832, %v192_v26  }
  0x69   : > { %341 = vperm.xlu1 %2835, %v192_v26  }
  0x6c   : > { %520 = vperm.xlu0 %2832, %v193_v27  }
  0x6d   : > { %346 = vperm.xlu1 %2835, %v193_v27  }
  0x70   : > { %524 = vperm.xlu0 %2832, %v194_v28  }
  0x71   : > { %351 = vperm.xlu1 %2835, %v194_v28  }
  0x74   : > { %528 = vperm.xlu0 %2832, %v195_v29  }
  0x75   : > { %356 = vperm.xlu1 %2835, %v195_v29  }
  0x78   : > { %532 = vperm.xlu0 %2832, %v196_v30  }
  0x79   : > { %361 = vperm.xlu1 %2835, %v196_v30  }
  0x7c   : > { %536 = vperm.xlu0 %2832, %v197_v31  }
  0x7d   : > { %366 = vperm.xlu1 %2835, %v197_v31  }
  0x80   : > { %540 = vperm.xlu0 %2832, %v198_v32  }
  0x81   : > { %371 = vperm.xlu1 %2835, %v198_v32  }
  0x84   : > { %544 = vperm.xlu0 %2832, %v199_v33  }
  0x85   : > { %376 = vperm.xlu1 %2835, %v199_v33  }
  0x88   : > { %548 = vperm.xlu0 %2832, %v200_v34  }
  0x89   : > { %381 = vperm.xlu1 %2835, %v200_v34  }
  0x8c   : > { %552 = vperm.xlu0 %2832, %v201_v35  }
  0x8d   : > { %386 = vperm.xlu1 %2835, %v201_v35  }
  0x90   : > { %556 = vperm.xlu0 %2832, %v202_v36  }
  0x91   : > { %391 = vperm.xlu1 %2835, %v202_v36  }
  0x92   : > { %v247_v38 = vpop.permute.xlu1 %246  ;;  %v242_v39 = vpop.permute.xlu0 %241 }
  0x93   : > { %v404_v44 = vmul.f32 %v3088_v40, %v247_v38  ;;  %v403_v45 = vmul.f32 %v3088_v40, %v242_v39 }
  0x94   : > { %560 = vperm.xlu0 %2832, %v203_v37  }
  0x95   : > { %396 = vperm.xlu1 %2835, %v203_v37  }
  0x97   : > { %v441_v42 = vpop.permute.xlu1 %440  ;;  %v437_v43 = vpop.permute.xlu0 %436 }
  0x98   : > { %v568_v46 = vmul.f32 %v3093_v41, %v441_v42  ;;  %v567_v47 = vmul.f32 %v3093_v41, %v437_v43 }
  0x9a   : > { %v600_v49 = vadd.f32 %v568_v46, %v404_v44  ;;  %v599_v50 = vadd.f32 %v567_v47, %v403_v45 }
  0x9b   : > { %v445_v51 = vpop.permute.xlu0 %444 }
  0x9c   : > { %v636_v52 = vadd.f32 %v3102_v48, %v600_v49  ;;  %v569_v53 = vmul.f32 %v3093_v41, %v445_v51  ;;  %v252_v54 = vpop.permute.xlu1 %251  ;;  %v635_v55 = vadd.f32 %v3102_v48, %v599_v50 }
  0x9d   : > { %v405_v56 = vmul.f32 %v3088_v40, %v252_v54 }
  0x9e   : > { %v668_v57 = vmax.f32 %v636_v52, 0.0  ;;  %v667_v58 = vmax.f32 %v635_v55, 0.0 }
  0x9f   : > { %v601_v59 = vadd.f32 %v569_v53, %v405_v56  ;;  %v449_v60 = vpop.permute.xlu0 %448 }
  0xa0   : > { %v570_v61 = vmul.f32 %v3093_v41, %v449_v60  ;;  %v257_v62 = vpop.permute.xlu1 %256  ;;  %2548 = vmatprep.mubr.msk.f32.mxu0 %vm703_vm0, %v667_v58 }
  0xa1   : > { %v637_v63 = vadd.f32 %v3102_v48, %v601_v59  ;;  %v406_v0 = vmul.f32 %v3088_v40, %v257_v62  ;;  %2549 = vmatmul.mubr.msk.f32.vlgmr.msra.gmra.mxu0 %vm703_vm0, %v668_v57 }
  0xa3   : > { %v669_v1 = vmax.f32 %v637_v63, 0.0  ;;  %v602_v2 = vadd.f32 %v570_v61, %v406_v0  ;;  %v453_v3 = vpop.permute.xlu0 %452 }
  0xa4   : > { %v571_v4 = vmul.f32 %v3093_v41, %v453_v3  ;;  %v262_v5 = vpop.permute.xlu1 %261 }
  0xa5   : > { %v638_v6 = vadd.f32 %v3102_v48, %v602_v2  ;;  %v407_v7 = vmul.f32 %v3088_v40, %v262_v5  ;;  %2551 = vmatprep.mubr.msk.f32.mxu0 %vm703_vm0, %v669_v1 }
  0xa7   : > { %v670_v8 = vmax.f32 %v638_v6, 0.0  ;;  %v603_v9 = vadd.f32 %v571_v4, %v407_v7  ;;  %v457_v10 = vpop.permute.xlu0 %456 }
  0xa8   : > { %v572_v11 = vmul.f32 %v3093_v41, %v457_v10  ;;  %v267_v12 = vpop.permute.xlu1 %266 }
  0xa9   : > { %v639_v13 = vadd.f32 %v3102_v48, %v603_v9  ;;  %v408_v14 = vmul.f32 %v3088_v40, %v267_v12  ;;  %2552 = vmatmul.mubr.msk.f32.gmra.mxu0 %vm703_vm0, %v670_v8 }
  0xab   : > { %v671_v15 = vmax.f32 %v639_v13, 0.0  ;;  %v604_v16 = vadd.f32 %v572_v11, %v408_v14  ;;  %v461_v17 = vpop.permute.xlu0 %460 }
  0xac   : > { %v573_v18 = vmul.f32 %v3093_v41, %v461_v17  ;;  %v272_v19 = vpop.permute.xlu1 %271 }
  0xad   : > { %v640_v20 = vadd.f32 %v3102_v48, %v604_v16  ;;  %v409_v21 = vmul.f32 %v3088_v40, %v272_v19  ;;  %2554 = vmatprep.mubr.msk.f32.mxu0 %vm703_vm0, %v671_v15 }
  0xaf   : > { %v672_v22 = vmax.f32 %v640_v20, 0.0  ;;  %v605_v23 = vadd.f32 %v573_v18, %v409_v21  ;;  %v465_v24 = vpop.permute.xlu0 %464 }
  0xb0   : > { %v574_v25 = vmul.f32 %v3093_v41, %v465_v24  ;;  %v277_v26 = vpop.permute.xlu1 %276 }
  0xb1   : > { %v641_v27 = vadd.f32 %v3102_v48, %v605_v23  ;;  %v410_v28 = vmul.f32 %v3088_v40, %v277_v26  ;;  %2555 = vmatmul.mubr.msk.f32.gmra.mxu0 %vm703_vm0, %v672_v22 }
  0xb3   : > { %v673_v29 = vmax.f32 %v641_v27, 0.0  ;;  %v606_v30 = vadd.f32 %v574_v25, %v410_v28  ;;  %v469_v31 = vpop.permute.xlu0 %468 }
  0xb4   : > { %v575_v32 = vmul.f32 %v3093_v41, %v469_v31  ;;  %v282_v33 = vpop.permute.xlu1 %281 }
  0xb5   : > { %v642_v34 = vadd.f32 %v3102_v48, %v606_v30  ;;  %v411_v35 = vmul.f32 %v3088_v40, %v282_v33  ;;  %2557 = vmatprep.mubr.msk.f32.mxu0 %vm703_vm0, %v673_v29 }
  0xb7   : > { %v674_v36 = vmax.f32 %v642_v34, 0.0  ;;  %v607_v37 = vadd.f32 %v575_v32, %v411_v35  ;;  %v473_v38 = vpop.permute.xlu0 %472 }
  0xb8   : > { %v576_v39 = vmul.f32 %v3093_v41, %v473_v38  ;;  %v287_v42 = vpop.permute.xlu1 %286 }
  0xb9   : > { %v643_v43 = vadd.f32 %v3102_v48, %v607_v37  ;;  %v412_v44 = vmul.f32 %v3088_v40, %v287_v42  ;;  %2558 = vmatmul.mubr.msk.f32.gmra.mxu0 %vm703_vm0, %v674_v36 }
  0xbb   : > { %v675_v45 = vmax.f32 %v643_v43, 0.0  ;;  %v608_v46 = vadd.f32 %v576_v39, %v412_v44  ;;  %v477_v47 = vpop.permute.xlu0 %476 }
  0xbc   : > { %v577_v49 = vmul.f32 %v3093_v41, %v477_v47  ;;  %v292_v50 = vpop.permute.xlu1 %291 }
  0xbd   : > { %v644_v51 = vadd.f32 %v3102_v48, %v608_v46  ;;  %v413_v52 = vmul.f32 %v3088_v40, %v292_v50  ;;  %2560 = vmatprep.mubr.msk.f32.mxu0 %vm703_vm0, %v675_v45 }
  0xbf   : > { %v676_v53 = vmax.f32 %v644_v51, 0.0  ;;  %v609_v54 = vadd.f32 %v577_v49, %v413_v52  ;;  %v481_v55 = vpop.permute.xlu0 %480 }
  0xc0   : > { %v578_v56 = vmul.f32 %v3093_v41, %v481_v55  ;;  %v297_v57 = vpop.permute.xlu1 %296 }
  0xc1   : > { %v645_v58 = vadd.f32 %v3102_v48, %v609_v54  ;;  %v414_v59 = vmul.f32 %v3088_v40, %v297_v57  ;;  %2561 = vmatmul.mubr.msk.f32.gmra.mxu0 %vm703_vm0, %v676_v53  ;;  %v218_v53 = vld [vmem:[%s3729_s1 + $0x68] sm:$0xff] }
  0xc2   : > { %2596 = vmatprep.subr.mxu1 %v218_v53 }
  0xc3   : > { %v677_v60 = vmax.f32 %v645_v58, 0.0  ;;  %v610_v61 = vadd.f32 %v578_v56, %v414_v59  ;;  %v485_v62 = vpop.permute.xlu0 %484  ;;  %2597 = vmatpush3.msra.mxu1 %v218_v53  ;;  %v217_v56 = vld [vmem:[%s3729_s1 + $0x48] sm:$0xff] }
  0xc4   : > { %v579_v63 = vmul.f32 %v3093_v41, %v485_v62  ;;  %v302_v0 = vpop.permute.xlu1 %301  ;;  %2598 = vmatprep.subr.mxu1 %v217_v56  ;;  %v216_v62 = vld [vmem:[%s3729_s1 + $0x28] sm:$0xff] }
  0xc5   : > { %v646_v1 = vadd.f32 %v3102_v48, %v610_v61  ;;  %v415_v2 = vmul.f32 %v3088_v40, %v302_v0  ;;  %2563 = vmatprep.mubr.msk.f32.mxu0 %vm703_vm0, %v677_v60  ;;  %2599 = vmatpush3.msra.mxu1 %v217_v56 }
  0xc6   : > { %2600 = vmatprep.subr.mxu1 %v216_v62 }
  0xc7   : > { %v678_v3 = vmax.f32 %v646_v1, 0.0  ;;  %v611_v4 = vadd.f32 %v579_v63, %v415_v2  ;;  %v489_v5 = vpop.permute.xlu0 %488  ;;  %2601 = vmatpush3.msra.mxu1 %v216_v62  ;;  %v215_v1 = vld [vmem:[%s3729_s1 + $0x8] sm:$0xff] }
  0xc8   : > { %v580_v6 = vmul.f32 %v3093_v41, %v489_v5  ;;  %v307_v7 = vpop.permute.xlu1 %306  ;;  %2602 = vmatprep.subr.mxu1 %v215_v1 }
  0xc9   : > { %v647_v8 = vadd.f32 %v3102_v48, %v611_v4  ;;  %v416_v9 = vmul.f32 %v3088_v40, %v307_v7  ;;  %2564 = vmatmul.mubr.msk.f32.gmra.mxu0 %vm703_vm0, %v678_v3  ;;  %2603 = vmatpush3.msra.mxu1 %v215_v1 }
  0xcb   : > { %v679_v10 = vmax.f32 %v647_v8, 0.0  ;;  %v612_v11 = vadd.f32 %v580_v6, %v416_v9  ;;  %v493_v12 = vpop.permute.xlu0 %492 }
  0xcc   : > { %v581_v13 = vmul.f32 %v3093_v41, %v493_v12  ;;  %v312_v14 = vpop.permute.xlu1 %311 }
  0xcd   : > { %v648_v15 = vadd.f32 %v3102_v48, %v612_v11  ;;  %v417_v16 = vmul.f32 %v3088_v40, %v312_v14  ;;  %2566 = vmatprep.mubr.msk.f32.mxu0 %vm703_vm0, %v679_v10 }
  0xcf   : > { %v680_v17 = vmax.f32 %v648_v15, 0.0  ;;  %v613_v18 = vadd.f32 %v581_v13, %v417_v16  ;;  %v497_v19 = vpop.permute.xlu0 %496 }
  0xd0   : > { %v582_v20 = vmul.f32 %v3093_v41, %v497_v19  ;;  %v317_v21 = vpop.permute.xlu1 %316 }
  0xd1   : > { %v649_v22 = vadd.f32 %v3102_v48, %v613_v18  ;;  %v418_v23 = vmul.f32 %v3088_v40, %v317_v21  ;;  %2567 = vmatmul.mubr.msk.f32.gmra.mxu0 %vm703_vm0, %v680_v17 }
  0xd3   : > { %v681_v24 = vmax.f32 %v649_v22, 0.0  ;;  %v614_v25 = vadd.f32 %v582_v20, %v418_v23  ;;  %v501_v26 = vpop.permute.xlu0 %500 }
  0xd4   : > { %v583_v27 = vmul.f32 %v3093_v41, %v501_v26  ;;  %v322_v28 = vpop.permute.xlu1 %321 }
  0xd5   : > { %v650_v29 = vadd.f32 %v3102_v48, %v614_v25  ;;  %v419_v30 = vmul.f32 %v3088_v40, %v322_v28  ;;  %2569 = vmatprep.mubr.msk.f32.mxu0 %vm703_vm0, %v681_v24 }
  0xd7   : > { %v682_v31 = vmax.f32 %v650_v29, 0.0  ;;  %v615_v32 = vadd.f32 %v583_v27, %v419_v30  ;;  %v505_v33 = vpop.permute.xlu0 %504 }
  0xd8   : > { %v584_v34 = vmul.f32 %v3093_v41, %v505_v33  ;;  %v327_v35 = vpop.permute.xlu1 %326 }
  0xd9   : > { %v651_v36 = vadd.f32 %v3102_v48, %v615_v32  ;;  %v420_v37 = vmul.f32 %v3088_v40, %v327_v35  ;;  %2570 = vmatmul.mubr.msk.f32.gmra.mxu0 %vm703_vm0, %v682_v31 }
  0xdb   : > { %v683_v38 = vmax.f32 %v651_v36, 0.0  ;;  %v616_v39 = vadd.f32 %v584_v34, %v420_v37  ;;  %v509_v42 = vpop.permute.xlu0 %508 }
  0xdc   : > { %v585_v43 = vmul.f32 %v3093_v41, %v509_v42  ;;  %v332_v44 = vpop.permute.xlu1 %331 }
  0xdd   : > { %v652_v45 = vadd.f32 %v3102_v48, %v616_v39  ;;  %v421_v46 = vmul.f32 %v3088_v40, %v332_v44  ;;  %2572 = vmatprep.mubr.msk.f32.mxu0 %vm703_vm0, %v683_v38 }
  0xdf   : > { %v684_v47 = vmax.f32 %v652_v45, 0.0  ;;  %v617_v49 = vadd.f32 %v585_v43, %v421_v46  ;;  %v513_v50 = vpop.permute.xlu0 %512 }
  0xe0   : > { %v586_v51 = vmul.f32 %v3093_v41, %v513_v50  ;;  %v337_v52 = vpop.permute.xlu1 %336 }
  0xe1   : > { %v653_v54 = vadd.f32 %v3102_v48, %v617_v49  ;;  %v422_v55 = vmul.f32 %v3088_v40, %v337_v52  ;;  %2573 = vmatmul.mubr.msk.f32.gmra.mxu0 %vm703_vm0, %v684_v47 }
  0xe3   : > { %v685_v57 = vmax.f32 %v653_v54, 0.0  ;;  %v618_v58 = vadd.f32 %v586_v51, %v422_v55  ;;  %v517_v59 = vpop.permute.xlu0 %516 }
  0xe4   : > { %v587_v60 = vmul.f32 %v3093_v41, %v517_v59  ;;  %v342_v61 = vpop.permute.xlu1 %341 }
  0xe5   : > { %v654_v63 = vadd.f32 %v3102_v48, %v618_v58  ;;  %v423_v0 = vmul.f32 %v3088_v40, %v342_v61  ;;  %2575 = vmatprep.mubr.msk.f32.mxu0 %vm703_vm0, %v685_v57 }
  0xe7   : > { %v686_v2 = vmax.f32 %v654_v63, 0.0  ;;  %v619_v3 = vadd.f32 %v587_v60, %v423_v0  ;;  %v521_v4 = vpop.permute.xlu0 %520 }
  0xe8   : > { %v588_v5 = vmul.f32 %v3093_v41, %v521_v4  ;;  %v347_v6 = vpop.permute.xlu1 %346 }
  0xe9   : > { %v655_v7 = vadd.f32 %v3102_v48, %v619_v3  ;;  %v424_v8 = vmul.f32 %v3088_v40, %v347_v6  ;;  %2576 = vmatmul.mubr.msk.f32.gmra.mxu0 %vm703_vm0, %v686_v2 }
  0xeb   : > { %v687_v9 = vmax.f32 %v655_v7, 0.0  ;;  %v620_v10 = vadd.f32 %v588_v5, %v424_v8  ;;  %v525_v11 = vpop.permute.xlu0 %524 }
  0xec   : > { %v589_v12 = vmul.f32 %v3093_v41, %v525_v11  ;;  %v352_v13 = vpop.permute.xlu1 %351 }
  0xed   : > { %v656_v14 = vadd.f32 %v3102_v48, %v620_v10  ;;  %v425_v15 = vmul.f32 %v3088_v40, %v352_v13  ;;  %2578 = vmatprep.mubr.msk.f32.mxu0 %vm703_vm0, %v687_v9 }
  0xef   : > { %v688_v16 = vmax.f32 %v656_v14, 0.0  ;;  %v621_v17 = vadd.f32 %v589_v12, %v425_v15  ;;  %v529_v18 = vpop.permute.xlu0 %528 }
  0xf0   : > { %v590_v19 = vmul.f32 %v3093_v41, %v529_v18  ;;  %v357_v20 = vpop.permute.xlu1 %356 }
  0xf1   : > { %v657_v21 = vadd.f32 %v3102_v48, %v621_v17  ;;  %v426_v22 = vmul.f32 %v3088_v40, %v357_v20  ;;  %2579 = vmatmul.mubr.msk.f32.gmra.mxu0 %vm703_vm0, %v688_v16 }
  0xf3   : > { %v689_v23 = vmax.f32 %v657_v21, 0.0  ;;  %v622_v24 = vadd.f32 %v590_v19, %v426_v22  ;;  %v533_v25 = vpop.permute.xlu0 %532 }
  0xf4   : > { %v591_v26 = vmul.f32 %v3093_v41, %v533_v25  ;;  %v362_v27 = vpop.permute.xlu1 %361 }
  0xf5   : > { %v658_v28 = vadd.f32 %v3102_v48, %v622_v24  ;;  %v427_v29 = vmul.f32 %v3088_v40, %v362_v27  ;;  %2581 = vmatprep.mubr.msk.f32.mxu0 %vm703_vm0, %v689_v23 }
  0xf7   : > { %v690_v30 = vmax.f32 %v658_v28, 0.0  ;;  %v623_v31 = vadd.f32 %v591_v26, %v427_v29  ;;  %v537_v32 = vpop.permute.xlu0 %536 }
  0xf8   : > { %v592_v33 = vmul.f32 %v3093_v41, %v537_v32  ;;  %v367_v34 = vpop.permute.xlu1 %366 }
  0xf9   : > { %v659_v35 = vadd.f32 %v3102_v48, %v623_v31  ;;  %v428_v36 = vmul.f32 %v3088_v40, %v367_v34  ;;  %2582 = vmatmul.mubr.msk.f32.gmra.mxu0 %vm703_vm0, %v690_v30 }
  0xfb   : > { %v691_v37 = vmax.f32 %v659_v35, 0.0  ;;  %v624_v38 = vadd.f32 %v592_v33, %v428_v36  ;;  %v541_v39 = vpop.permute.xlu0 %540 }
  0xfc   : > { %v593_v42 = vmul.f32 %v3093_v41, %v541_v39  ;;  %v372_v43 = vpop.permute.xlu1 %371 }
  0xfd   : > { %v660_v44 = vadd.f32 %v3102_v48, %v624_v38  ;;  %v429_v45 = vmul.f32 %v3088_v40, %v372_v43  ;;  %2584 = vmatprep.mubr.msk.f32.mxu0 %vm703_vm0, %v691_v37 }
  0xff   : > { %v692_v46 = vmax.f32 %v660_v44, 0.0  ;;  %v625_v47 = vadd.f32 %v593_v42, %v429_v45  ;;  %v545_v49 = vpop.permute.xlu0 %544 }
 0x100   : > { %v594_v50 = vmul.f32 %v3093_v41, %v545_v49  ;;  %v377_v51 = vpop.permute.xlu1 %376 }
 0x101   : > { %v661_v52 = vadd.f32 %v3102_v48, %v625_v47  ;;  %v430_v53 = vmul.f32 %v3088_v40, %v377_v51  ;;  %2585 = vmatmul.mubr.msk.f32.gmra.mxu0 %vm703_vm0, %v692_v46 }
 0x103   : > { %v693_v54 = vmax.f32 %v661_v52, 0.0  ;;  %v626_v55 = vadd.f32 %v594_v50, %v430_v53  ;;  %v549_v56 = vpop.permute.xlu0 %548 }
 0x104   : > { %v595_v57 = vmul.f32 %v3093_v41, %v549_v56  ;;  %v382_v58 = vpop.permute.xlu1 %381 }
 0x105   : > { %v662_v59 = vadd.f32 %v3102_v48, %v626_v55  ;;  %v431_v60 = vmul.f32 %v3088_v40, %v382_v58  ;;  %2587 = vmatprep.mubr.msk.f32.mxu0 %vm703_vm0, %v693_v54 }
 0x107   : > { %v694_v61 = vmax.f32 %v662_v59, 0.0  ;;  %v627_v62 = vadd.f32 %v595_v57, %v431_v60  ;;  %v553_v63 = vpop.permute.xlu0 %552 }
 0x108   : > { %v596_v0 = vmul.f32 %v3093_v41, %v553_v63  ;;  %v387_v1 = vpop.permute.xlu1 %386 }
 0x109   : > { %v663_v2 = vadd.f32 %v3102_v48, %v627_v62  ;;  %v432_v3 = vmul.f32 %v3088_v40, %v387_v1  ;;  %2588 = vmatmul.mubr.msk.f32.gmra.mxu0 %vm703_vm0, %v694_v61 }
 0x10b   : > { %v695_v4 = vmax.f32 %v663_v2, 0.0  ;;  %v628_v5 = vadd.f32 %v596_v0, %v432_v3  ;;  %v557_v6 = vpop.permute.xlu0 %556 }
 0x10c   : > { %v597_v7 = vmul.f32 %v3093_v41, %v557_v6  ;;  %v392_v8 = vpop.permute.xlu1 %391 }
 0x10d   : > { %v664_v9 = vadd.f32 %v3102_v48, %v628_v5  ;;  %v433_v10 = vmul.f32 %v3088_v40, %v392_v8  ;;  %2590 = vmatprep.mubr.msk.f32.mxu0 %vm703_vm0, %v695_v4 }
 0x10f   : > { %v696_v11 = vmax.f32 %v664_v9, 0.0  ;;  %v629_v12 = vadd.f32 %v597_v7, %v433_v10  ;;  %v561_v13 = vpop.permute.xlu0 %560 }
 0x110   : > { %v598_v14 = vmul.f32 %v3093_v41, %v561_v13  ;;  %v397_v15 = vpop.permute.xlu1 %396  ;;  %v3243_v41 = vld [vmem:[%s3730_s2 + $0x3] ss:$0 sm:$0xff] }
 0x111   : > { %v665_v16 = vadd.f32 %v3102_v48, %v629_v12  ;;  %v434_v17 = vmul.f32 %v3088_v40, %v397_v15  ;;  %2591 = vmatmul.mubr.msk.f32.gmra.mxu0 %vm703_vm0, %v696_v11  ;;  %v222_v40 = vld [vmem:[%s3729_s1 + $0x70] sm:$0xff] }
 0x112   : > { %2652 = vmatprep.subr.mxu0 %v222_v40 }
 0x113   : > { %v697_v18 = vmax.f32 %v665_v16, 0.0  ;;  %v630_v19 = vadd.f32 %v598_v14, %v434_v17  ;;  %2653 = vmatpush3.msra.mxu0 %v222_v40  ;;  %v221_v14 = vld [vmem:[%s3729_s1 + $0x50] sm:$0xff] }
 0x114   : > { %2654 = vmatprep.subr.mxu0 %v221_v14  ;;  %v220_v16 = vld [vmem:[%s3729_s1 + $0x30] sm:$0xff] }
 0x115   : > { %v666_v20 = vadd.f32 %v3102_v48, %v630_v19  ;;  %2593 = vmatprep.mubr.msk.f32.mxu0 %vm703_vm0, %v697_v18  ;;  %2655 = vmatpush3.msra.mxu0 %v221_v14 }
 0x116   : > { %2656 = vmatprep.subr.mxu0 %v220_v16 }
 0x117   : > { %v698_v21 = vmax.f32 %v666_v20, 0.0  ;;  %2657 = vmatpush3.msra.mxu0 %v220_v16  ;;  %v219_v20 = vld [vmem:[%s3729_s1 + $0x10] sm:$0xff] }
 0x118   : > { %2658 = vmatprep.subr.mxu0 %v219_v20 }
 0x119   : > { %2594 = vmatmul.mubr.msk.f32.gmra.mxu0 %vm703_vm0, %v698_v21 }
 0x11a   : > { %2659 = vmatpush3.msra.mxu0 %v219_v20 }
 0x161   : > { %v2550_v22 = vpop.f32.mrf.mxu0 }
 0x162   : > { %v872_v23 = vadd.f32 %v2550_v22, %v3243_v41 }
 0x163   : > { %v866_v24 = vpop.f32.mrf.mxu0 }
 0x164   : > { %v867_v48 = vadd.f32 %v3243_v41, %v866_v24  ;;  %v1026_v26 = vmax.f32 %v872_v23, 0.0 }
 0x166   : > { %v1025_v25 = vmax.f32 %v867_v48, 0.0 }
 0x168   : > { %2604 = vmatprep.mubr.msk.f32.mxu1 %vm703_vm0, %v1025_v25 }
 0x169   : > { %v2553_v27 = vpop.f32.mrf.mxu0  ;;  %2605 = vmatmul.mubr.msk.f32.vlgmr.msra.gmra.mxu1 %vm703_vm0, %v1026_v26 }
 0x16a   : > { %v882_v28 = vadd.f32 %v2553_v27, %v3243_v41 }
 0x16b   : > { %v876_v29 = vpop.f32.mrf.mxu0 }
 0x16c   : > { %v877_v30 = vadd.f32 %v3243_v41, %v876_v29  ;;  %v1028_v32 = vmax.f32 %v882_v28, 0.0 }
 0x16e   : > { %v1027_v31 = vmax.f32 %v877_v30, 0.0 }
 0x170   : > { %2607 = vmatprep.mubr.msk.f32.mxu1 %vm703_vm0, %v1027_v31 }
 0x171   : > { %v2556_v33 = vpop.f32.mrf.mxu0  ;;  %2608 = vmatmul.mubr.msk.f32.gmra.mxu1 %vm703_vm0, %v1028_v32 }
 0x172   : > { %v892_v34 = vadd.f32 %v2556_v33, %v3243_v41 }
 0x173   : > { %v886_v35 = vpop.f32.mrf.mxu0 }
 0x174   : > { %v887_v36 = vadd.f32 %v3243_v41, %v886_v35  ;;  %v1030_v38 = vmax.f32 %v892_v34, 0.0 }
 0x176   : > { %v1029_v37 = vmax.f32 %v887_v36, 0.0 }
 0x178   : > { %2610 = vmatprep.mubr.msk.f32.mxu1 %vm703_vm0, %v1029_v37 }
 0x179   : > { %v2559_v39 = vpop.f32.mrf.mxu0  ;;  %2611 = vmatmul.mubr.msk.f32.gmra.mxu1 %vm703_vm0, %v1030_v38 }
 0x17a   : > { %v902_v42 = vadd.f32 %v2559_v39, %v3243_v41 }
 0x17b   : > { %v896_v43 = vpop.f32.mrf.mxu0 }
 0x17c   : > { %v897_v44 = vadd.f32 %v3243_v41, %v896_v43  ;;  %v1032_v46 = vmax.f32 %v902_v42, 0.0 }
 0x17e   : > { %v1031_v45 = vmax.f32 %v897_v44, 0.0 }
 0x180   : > { %2613 = vmatprep.mubr.msk.f32.mxu1 %vm703_vm0, %v1031_v45 }
 0x181   : > { %v2562_v47 = vpop.f32.mrf.mxu0  ;;  %2614 = vmatmul.mubr.msk.f32.gmra.mxu1 %vm703_vm0, %v1032_v46 }
 0x182   : > { %v912_v49 = vadd.f32 %v2562_v47, %v3243_v41 }
 0x183   : > { %v906_v50 = vpop.f32.mrf.mxu0 }
 0x184   : > { %v907_v51 = vadd.f32 %v3243_v41, %v906_v50  ;;  %v1034_v53 = vmax.f32 %v912_v49, 0.0 }
 0x186   : > { %v1033_v52 = vmax.f32 %v907_v51, 0.0 }
 0x188   : > { %2616 = vmatprep.mubr.msk.f32.mxu1 %vm703_vm0, %v1033_v52 }
 0x189   : > { %v2565_v54 = vpop.f32.mrf.mxu0  ;;  %2617 = vmatmul.mubr.msk.f32.gmra.mxu1 %vm703_vm0, %v1034_v53 }
 0x18a   : > { %v922_v55 = vadd.f32 %v2565_v54, %v3243_v41 }
 0x18b   : > { %v916_v56 = vpop.f32.mrf.mxu0 }
 0x18c   : > { %v917_v57 = vadd.f32 %v3243_v41, %v916_v56  ;;  %v1036_v59 = vmax.f32 %v922_v55, 0.0 }
 0x18e   : > { %v1035_v58 = vmax.f32 %v917_v57, 0.0 }
 0x190   : > { %2619 = vmatprep.mubr.msk.f32.mxu1 %vm703_vm0, %v1035_v58 }
 0x191   : > { %v2568_v60 = vpop.f32.mrf.mxu0  ;;  %2620 = vmatmul.mubr.msk.f32.gmra.mxu1 %vm703_vm0, %v1036_v59 }
 0x192   : > { %v932_v61 = vadd.f32 %v2568_v60, %v3243_v41  ;;  %v238_v60 = vld [vmem:[%s3729_s1 + $0x1f8] sm:$0xff] }
 0x193   : > { %v926_v62 = vpop.f32.mrf.mxu0  ;;  %2708 = vmatprep.subr.mxu1 %v238_v60 }
 0x194   : > { %v927_v63 = vadd.f32 %v3243_v41, %v926_v62  ;;  %v1038_v1 = vmax.f32 %v932_v61, 0.0  ;;  %v237_v61 = vld [vmem:[%s3729_s1 + $0x1d8] sm:$0xff]  ;;  %2709 = vmatpush3.msra.mxu1 %v238_v60 }
 0x195   : > { %2710 = vmatprep.subr.mxu1 %v237_v61 }
 0x196   : > { %v1037_v0 = vmax.f32 %v927_v63, 0.0  ;;  %v3333_v63 = vld [vmem:[%s3730_s2 + $0x4] ss:$0 sm:$0xff]  ;;  %2711 = vmatpush3.msra.mxu1 %v237_v61 }
 0x198   : > { %2622 = vmatprep.mubr.msk.f32.mxu1 %vm703_vm0, %v1037_v0 }
 0x199   : > { %v2571_v2 = vpop.f32.mrf.mxu0  ;;  %2623 = vmatmul.mubr.msk.f32.gmra.mxu1 %vm703_vm0, %v1038_v1  ;;  %v235_v1 = vld [vmem:[%s3729_s1 + $0x198] sm:$0xff] }
 0x19a   : > { %v942_v3 = vadd.f32 %v2571_v2, %v3243_v41 }
 0x19b   : > { %v936_v4 = vpop.f32.mrf.mxu0 }
 0x19c   : > { %v937_v5 = vadd.f32 %v3243_v41, %v936_v4  ;;  %v1040_v7 = vmax.f32 %v942_v3, 0.0  ;;  %v234_v4 = vld [vmem:[%s3729_s1 + $0x178] sm:$0xff] }
 0x19e   : > { %v1039_v6 = vmax.f32 %v937_v5, 0.0  ;;  %v233_v5 = vld [vmem:[%s3729_s1 + $0x158] sm:$0xff] }
 0x1a0   : > { %2625 = vmatprep.mubr.msk.f32.mxu1 %vm703_vm0, %v1039_v6 }
 0x1a1   : > { %v2574_v8 = vpop.f32.mrf.mxu0  ;;  %2626 = vmatmul.mubr.msk.f32.gmra.mxu1 %vm703_vm0, %v1040_v7  ;;  %v232_v7 = vld [vmem:[%s3729_s1 + $0x138] sm:$0xff] }
 0x1a2   : > { %v952_v9 = vadd.f32 %v2574_v8, %v3243_v41 }
 0x1a3   : > { %v946_v10 = vpop.f32.mrf.mxu0 }
 0x1a4   : > { %v947_v11 = vadd.f32 %v3243_v41, %v946_v10  ;;  %v1042_v13 = vmax.f32 %v952_v9, 0.0  ;;  %v231_v9 = vld [vmem:[%s3729_s1 + $0x118] sm:$0xff] }
 0x1a6   : > { %v1041_v12 = vmax.f32 %v947_v11, 0.0 }
 0x1a8   : > { %2628 = vmatprep.mubr.msk.f32.mxu1 %vm703_vm0, %v1041_v12  ;;  %v230_v12 = vld [vmem:[%s3729_s1 + $0xf8] sm:$0xff] }
 0x1a9   : > { %v2577_v15 = vpop.f32.mrf.mxu0  ;;  %2629 = vmatmul.mubr.msk.f32.gmra.mxu1 %vm703_vm0, %v1042_v13  ;;  %v229_v13 = vld [vmem:[%s3729_s1 + $0xd8] sm:$0xff] }
 0x1aa   : > { %v962_v17 = vadd.f32 %v2577_v15, %v3243_v41  ;;  %v228_v15 = vld [vmem:[%s3729_s1 + $0xb8] sm:$0xff] }
 0x1ab   : > { %v956_v18 = vpop.f32.mrf.mxu0 }
 0x1ac   : > { %v957_v19 = vadd.f32 %v3243_v41, %v956_v18  ;;  %v1044_v22 = vmax.f32 %v962_v17, 0.0  ;;  %v227_v17 = vld [vmem:[%s3729_s1 + $0x98] sm:$0xff] }
 0x1ae   : > { %v1043_v21 = vmax.f32 %v957_v19, 0.0 }
 0x1b0   : > { %2631 = vmatprep.mubr.msk.f32.mxu1 %vm703_vm0, %v1043_v21 }
 0x1b1   : > { %v2580_v40 = vpop.f32.mrf.mxu0  ;;  %2632 = vmatmul.mubr.msk.f32.gmra.mxu1 %vm703_vm0, %v1044_v22 }
 0x1b2   : > { %v972_v23 = vadd.f32 %v2580_v40, %v3243_v41 }
 0x1b3   : > { %v966_v24 = vpop.f32.mrf.mxu0 }
 0x1b4   : > { %v967_v48 = vadd.f32 %v3243_v41, %v966_v24  ;;  %v1046_v26 = vmax.f32 %v972_v23, 0.0 }
 0x1b6   : > { %v1045_v25 = vmax.f32 %v967_v48, 0.0 }
 0x1b8   : > { %2634 = vmatprep.mubr.msk.f32.mxu1 %vm703_vm0, %v1045_v25 }
 0x1b9   : > { %v2583_v27 = vpop.f32.mrf.mxu0  ;;  %2635 = vmatmul.mubr.msk.f32.gmra.mxu1 %vm703_vm0, %v1046_v26 }
 0x1ba   : > { %v982_v28 = vadd.f32 %v2583_v27, %v3243_v41 }
 0x1bb   : > { %v976_v29 = vpop.f32.mrf.mxu0 }
 0x1bc   : > { %v977_v30 = vadd.f32 %v3243_v41, %v976_v29  ;;  %v1048_v32 = vmax.f32 %v982_v28, 0.0 }
 0x1be   : > { %v1047_v31 = vmax.f32 %v977_v30, 0.0 }
 0x1c0   : > { %2637 = vmatprep.mubr.msk.f32.mxu1 %vm703_vm0, %v1047_v31 }
 0x1c1   : > { %v2586_v33 = vpop.f32.mrf.mxu0  ;;  %2638 = vmatmul.mubr.msk.f32.gmra.mxu1 %vm703_vm0, %v1048_v32 }
 0x1c2   : > { %v992_v34 = vadd.f32 %v2586_v33, %v3243_v41 }
 0x1c3   : > { %v986_v35 = vpop.f32.mrf.mxu0 }
 0x1c4   : > { %v987_v36 = vadd.f32 %v3243_v41, %v986_v35  ;;  %v1050_v38 = vmax.f32 %v992_v34, 0.0 }
 0x1c6   : > { %v1049_v37 = vmax.f32 %v987_v36, 0.0 }
 0x1c8   : > { %2640 = vmatprep.mubr.msk.f32.mxu1 %vm703_vm0, %v1049_v37 }
 0x1c9   : > { %v2589_v39 = vpop.f32.mrf.mxu0  ;;  %2641 = vmatmul.mubr.msk.f32.gmra.mxu1 %vm703_vm0, %v1050_v38 }
 0x1ca   : > { %v1002_v42 = vadd.f32 %v2589_v39, %v3243_v41 }
 0x1cb   : > { %v996_v43 = vpop.f32.mrf.mxu0 }
 0x1cc   : > { %v997_v44 = vadd.f32 %v3243_v41, %v996_v43  ;;  %v1052_v46 = vmax.f32 %v1002_v42, 0.0 }
 0x1ce   : > { %v1051_v45 = vmax.f32 %v997_v44, 0.0  ;;  %v226_v44 = vld [vmem:[%s3729_s1 + $0x78] sm:$0xff] }
 0x1d0   : > { %2643 = vmatprep.mubr.msk.f32.mxu1 %vm703_vm0, %v1051_v45  ;;  %v225_v45 = vld [vmem:[%s3729_s1 + $0x58] sm:$0xff] }
 0x1d1   : > { %v2592_v47 = vpop.f32.mrf.mxu0  ;;  %2644 = vmatmul.mubr.msk.f32.gmra.mxu1 %vm703_vm0, %v1052_v46 }
 0x1d2   : > { %v1012_v49 = vadd.f32 %v2592_v47, %v3243_v41  ;;  %v224_v47 = vld [vmem:[%s3729_s1 + $0x38] sm:$0xff] }
 0x1d3   : > { %v1006_v50 = vpop.f32.mrf.mxu0 }
 0x1d4   : > { %v1007_v51 = vadd.f32 %v3243_v41, %v1006_v50  ;;  %v1054_v53 = vmax.f32 %v1012_v49, 0.0 }
 0x1d6   : > { %v1053_v52 = vmax.f32 %v1007_v51, 0.0  ;;  %v223_v51 = vld [vmem:[%s3729_s1 + $0x18] sm:$0xff] }
 0x1d8   : > { %2646 = vmatprep.mubr.msk.f32.mxu1 %vm703_vm0, %v1053_v52 }
 0x1d9   : > { %v2595_v54 = vpop.f32.mrf.mxu0  ;;  %2647 = vmatmul.mubr.msk.f32.gmra.mxu1 %vm703_vm0, %v1054_v53 }
 0x1da   : > { %v1022_v55 = vadd.f32 %v2595_v54, %v3243_v41 }
 0x1db   : > { %v1016_v56 = vpop.f32.mrf.mxu0 }
 0x1dc   : > { %v1017_v57 = vadd.f32 %v3243_v41, %v1016_v56  ;;  %v1056_v59 = vmax.f32 %v1022_v55, 0.0  ;;  %v236_v41 = vld [vmem:[%s3729_s1 + $0x1b8] sm:$0xff] }
 0x1dd   : > { %2712 = vmatprep.subr.mxu1 %v236_v41 }
 0x1de   : > { %v1055_v58 = vmax.f32 %v1017_v57, 0.0  ;;  %2713 = vmatpush3.msra.mxu1 %v236_v41 }
 0x1df   : > { %2714 = vmatprep.subr.mxu1 %v235_v1 }
 0x1e0   : > { %2649 = vmatprep.mubr.msk.f32.mxu1 %vm703_vm0, %v1055_v58  ;;  %2715 = vmatpush3.msra.mxu1 %v235_v1 }
 0x1e1   : > { %2650 = vmatmul.mubr.msk.f32.gmra.mxu1 %vm703_vm0, %v1056_v59  ;;  %2716 = vmatprep.subr.mxu1 %v234_v4 }
 0x1e2   : > { %2717 = vmatpush3.msra.mxu1 %v234_v4 }
 0x1e3   : > { %2718 = vmatprep.subr.mxu1 %v233_v5 }
 0x1e4   : > { %2719 = vmatpush3.msra.mxu1 %v233_v5 }
 0x1e5   : > { %2720 = vmatprep.subr.mxu1 %v232_v7 }
 0x1e6   : > { %2721 = vmatpush3.msra.mxu1 %v232_v7 }
 0x1e7   : > { %2722 = vmatprep.subr.mxu1 %v231_v9 }
 0x1e8   : > { %2723 = vmatpush3.msra.mxu1 %v231_v9 }
 0x1e9   : > { %2724 = vmatprep.subr.mxu1 %v230_v12 }
 0x1ea   : > { %2725 = vmatpush3.msra.mxu1 %v230_v12 }
 0x1eb   : > { %2726 = vmatprep.subr.mxu1 %v229_v13 }
 0x1ec   : > { %2727 = vmatpush3.msra.mxu1 %v229_v13  ;;  %v3441_v13 = vld [vmem:[%s3730_s2 + $0x5] ss:$0 sm:$0xff] }
 0x1ed   : > { %2728 = vmatprep.subr.mxu1 %v228_v15 }
 0x1ee   : > { %2729 = vmatpush3.msra.mxu1 %v228_v15 }
 0x1ef   : > { %2730 = vmatprep.subr.mxu1 %v227_v17 }
 0x1f0   : > { %2731 = vmatpush3.msra.mxu1 %v227_v17 }
 0x1f1   : > { %2732 = vmatprep.subr.mxu1 %v226_v44 }
 0x1f2   : > { %2733 = vmatpush3.msra.mxu1 %v226_v44 }
 0x1f3   : > { %2734 = vmatprep.subr.mxu1 %v225_v45 }
 0x1f4   : > { %2735 = vmatpush3.msra.mxu1 %v225_v45 }
 0x1f5   : > { %2736 = vmatprep.subr.mxu1 %v224_v47 }
 0x1f6   : > { %2737 = vmatpush3.msra.mxu1 %v224_v47 }
 0x1f7   : > { %2738 = vmatprep.subr.mxu1 %v223_v51 }
 0x1f8   : > { %2739 = vmatpush3.msra.mxu1 %v223_v51 }
 0x229   : > { %v2606_v62 = vpop.f32.mrf.mxu1 }
 0x22a   : > { %v1229_v3 = vadd.f32 %v2606_v62, %v3333_v63 }
 0x22b   : > { %v1223_v0 = vpop.f32.mrf.mxu1 }
 0x22c   : > { %v1224_v2 = vadd.f32 %v3333_v63, %v1223_v0 }
 0x22e   : > { %2660 = vmatprep.mubr.msk.f32.mxu0 %vm703_vm0, %v1224_v2 }
 0x22f   : > { %2661 = vmatmul.mubr.msk.f32.vlgmr.msra.gmra.mxu0 %vm703_vm0, %v1229_v3 }
 0x231   : > { %v2609_v6 = vpop.f32.mrf.mxu1 }
 0x232   : > { %v1239_v11 = vadd.f32 %v2609_v6, %v3333_v63 }
 0x233   : > { %v1233_v8 = vpop.f32.mrf.mxu1 }
 0x234   : > { %v1234_v10 = vadd.f32 %v3333_v63, %v1233_v8 }
 0x236   : > { %2663 = vmatprep.mubr.msk.f32.mxu0 %vm703_vm0, %v1234_v10 }
 0x237   : > { %2664 = vmatmul.mubr.msk.f32.gmra.mxu0 %vm703_vm0, %v1239_v11 }
 0x239   : > { %v2612_v14 = vpop.f32.mrf.mxu1 }
 0x23a   : > { %v1249_v19 = vadd.f32 %v2612_v14, %v3333_v63 }
 0x23b   : > { %v1243_v16 = vpop.f32.mrf.mxu1 }
 0x23c   : > { %v1244_v18 = vadd.f32 %v3333_v63, %v1243_v16 }
 0x23e   : > { %2666 = vmatprep.mubr.msk.f32.mxu0 %vm703_vm0, %v1244_v18 }
 0x23f   : > { %2667 = vmatmul.mubr.msk.f32.gmra.mxu0 %vm703_vm0, %v1249_v19 }
 0x241   : > { %v2615_v20 = vpop.f32.mrf.mxu1 }
 0x242   : > { %v1259_v40 = vadd.f32 %v2615_v20, %v3333_v63 }
 0x243   : > { %v1253_v21 = vpop.f32.mrf.mxu1 }
 0x244   : > { %v1254_v22 = vadd.f32 %v3333_v63, %v1253_v21 }
 0x246   : > { %2669 = vmatprep.mubr.msk.f32.mxu0 %vm703_vm0, %v1254_v22 }
 0x247   : > { %2670 = vmatmul.mubr.msk.f32.gmra.mxu0 %vm703_vm0, %v1259_v40 }
 0x249   : > { %v2618_v23 = vpop.f32.mrf.mxu1 }
 0x24a   : > { %v1269_v25 = vadd.f32 %v2618_v23, %v3333_v63 }
 0x24b   : > { %v1263_v24 = vpop.f32.mrf.mxu1 }
 0x24c   : > { %v1264_v48 = vadd.f32 %v3333_v63, %v1263_v24 }
 0x24e   : > { %2672 = vmatprep.mubr.msk.f32.mxu0 %vm703_vm0, %v1264_v48 }
 0x24f   : > { %2673 = vmatmul.mubr.msk.f32.gmra.mxu0 %vm703_vm0, %v1269_v25 }
 0x251   : > { %v2621_v26 = vpop.f32.mrf.mxu1 }
 0x252   : > { %v1279_v29 = vadd.f32 %v2621_v26, %v3333_v63 }
 0x253   : > { %v1273_v27 = vpop.f32.mrf.mxu1 }
 0x254   : > { %v1274_v28 = vadd.f32 %v3333_v63, %v1273_v27 }
 0x256   : > { %2675 = vmatprep.mubr.msk.f32.mxu0 %vm703_vm0, %v1274_v28 }
 0x257   : > { %2676 = vmatmul.mubr.msk.f32.gmra.mxu0 %vm703_vm0, %v1279_v29 }
 0x259   : > { %v2624_v30 = vpop.f32.mrf.mxu1 }
 0x25a   : > { %v1289_v33 = vadd.f32 %v2624_v30, %v3333_v63 }
 0x25b   : > { %v1283_v31 = vpop.f32.mrf.mxu1 }
 0x25c   : > { %v1284_v32 = vadd.f32 %v3333_v63, %v1283_v31 }
 0x25e   : > { %2678 = vmatprep.mubr.msk.f32.mxu0 %vm703_vm0, %v1284_v32 }
 0x25f   : > { %2679 = vmatmul.mubr.msk.f32.gmra.mxu0 %vm703_vm0, %v1289_v33 }
 0x261   : > { %v2627_v34 = vpop.f32.mrf.mxu1 }
 0x262   : > { %v1299_v37 = vadd.f32 %v2627_v34, %v3333_v63 }
 0x263   : > { %v1293_v35 = vpop.f32.mrf.mxu1 }
 0x264   : > { %v1294_v36 = vadd.f32 %v3333_v63, %v1293_v35 }
 0x266   : > { %2681 = vmatprep.mubr.msk.f32.mxu0 %vm703_vm0, %v1294_v36 }
 0x267   : > { %2682 = vmatmul.mubr.msk.f32.gmra.mxu0 %vm703_vm0, %v1299_v37 }
 0x269   : > { %v2630_v38 = vpop.f32.mrf.mxu1 }
 0x26a   : > { %v1309_v43 = vadd.f32 %v2630_v38, %v3333_v63 }
 0x26b   : > { %v1303_v39 = vpop.f32.mrf.mxu1 }
 0x26c   : > { %v1304_v42 = vadd.f32 %v3333_v63, %v1303_v39 }
 0x26e   : > { %2684 = vmatprep.mubr.msk.f32.mxu0 %vm703_vm0, %v1304_v42 }
 0x26f   : > { %2685 = vmatmul.mubr.msk.f32.gmra.mxu0 %vm703_vm0, %v1309_v43 }
 0x271   : > { %v2633_v46 = vpop.f32.mrf.mxu1 }
 0x272   : > { %v1319_v52 = vadd.f32 %v2633_v46, %v3333_v63 }
 0x273   : > { %v1313_v49 = vpop.f32.mrf.mxu1 }
 0x274   : > { %v1314_v50 = vadd.f32 %v3333_v63, %v1313_v49 }
 0x276   : > { %2687 = vmatprep.mubr.msk.f32.mxu0 %vm703_vm0, %v1314_v50 }
 0x277   : > { %2688 = vmatmul.mubr.msk.f32.gmra.mxu0 %vm703_vm0, %v1319_v52 }
 0x279   : > { %v2636_v53 = vpop.f32.mrf.mxu1 }
 0x27a   : > { %v1329_v56 = vadd.f32 %v2636_v53, %v3333_v63 }
 0x27b   : > { %v1323_v54 = vpop.f32.mrf.mxu1 }
 0x27c   : > { %v1324_v55 = vadd.f32 %v3333_v63, %v1323_v54 }
 0x27e   : > { %2690 = vmatprep.mubr.msk.f32.mxu0 %vm703_vm0, %v1324_v55 }
 0x27f   : > { %2691 = vmatmul.mubr.msk.f32.gmra.mxu0 %vm703_vm0, %v1329_v56 }
 0x281   : > { %v2639_v57 = vpop.f32.mrf.mxu1 }
 0x282   : > { %v1339_v60 = vadd.f32 %v2639_v57, %v3333_v63 }
 0x283   : > { %v1333_v58 = vpop.f32.mrf.mxu1 }
 0x284   : > { %v1334_v59 = vadd.f32 %v3333_v63, %v1333_v58 }
 0x286   : > { %2693 = vmatprep.mubr.msk.f32.mxu0 %vm703_vm0, %v1334_v59 }
 0x287   : > { %2694 = vmatmul.mubr.msk.f32.gmra.mxu0 %vm703_vm0, %v1339_v60 }
 0x289   : > { %v2642_v61 = vpop.f32.mrf.mxu1 }
 0x28a   : > { %v1349_v0 = vadd.f32 %v2642_v61, %v3333_v63 }
 0x28b   : > { %v1343_v62 = vpop.f32.mrf.mxu1 }
 0x28c   : > { %v1344_v41 = vadd.f32 %v3333_v63, %v1343_v62 }
 0x28e   : > { %2696 = vmatprep.mubr.msk.f32.mxu0 %vm703_vm0, %v1344_v41 }
 0x28f   : > { %2697 = vmatmul.mubr.msk.f32.gmra.mxu0 %vm703_vm0, %v1349_v0 }
 0x291   : > { %v2645_v1 = vpop.f32.mrf.mxu1 }
 0x292   : > { %v1359_v4 = vadd.f32 %v2645_v1, %v3333_v63 }
 0x293   : > { %v1353_v2 = vpop.f32.mrf.mxu1 }
 0x294   : > { %v1354_v3 = vadd.f32 %v3333_v63, %v1353_v2 }
 0x296   : > { %2699 = vmatprep.mubr.msk.f32.mxu0 %vm703_vm0, %v1354_v3 }
 0x297   : > { %2700 = vmatmul.mubr.msk.f32.gmra.mxu0 %vm703_vm0, %v1359_v4 }
 0x299   : > { %v2648_v5 = vpop.f32.mrf.mxu1 }
 0x29a   : > { %v1369_v8 = vadd.f32 %v2648_v5, %v3333_v63 }
 0x29b   : > { %v1363_v6 = vpop.f32.mrf.mxu1 }
 0x29c   : > { %v1364_v7 = vadd.f32 %v3333_v63, %v1363_v6 }
 0x29e   : > { %2702 = vmatprep.mubr.msk.f32.mxu0 %vm703_vm0, %v1364_v7 }
 0x29f   : > { %2703 = vmatmul.mubr.msk.f32.gmra.mxu0 %vm703_vm0, %v1369_v8 }
 0x2a1   : > { %v2651_v9 = vpop.f32.mrf.mxu1 }
 0x2a2   : > { %v1379_v12 = vadd.f32 %v2651_v9, %v3333_v63 }
 0x2a3   : > { %v1373_v10 = vpop.f32.mrf.mxu1 }
 0x2a4   : > { %v1374_v11 = vadd.f32 %v3333_v63, %v1373_v10 }
 0x2a6   : > { %2705 = vmatprep.mubr.msk.f32.mxu0 %vm703_vm0, %v1374_v11 }
 0x2a7   : > { %2706 = vmatmul.mubr.msk.f32.gmra.mxu0 %vm703_vm0, %v1379_v12 }
 0x2ef   : > { %v3443_v14 = vpop.f32.mrf.mxu0 }
 0x2f0   : > { %v1708_v15 = vsub.f32 %v3443_v14, %v3441_v13 }
 0x2f1   : > { %v3447_v16 = vpop.f32.mrf.mxu0 }
 0x2f2   : > { %v1707_v17 = vsub.f32 %v3447_v16, %v3441_v13  ;;  %v1740_v18 = vmul.f32 %v1708_v15, %v1708_v15 }
 0x2f4   : > { %v1739_v63 = vmul.f32 %v1707_v17, %v1707_v17 }
 0x2f6   : > { %2740 = vmatprep.mubr.f32.mxu1 %v1739_v63 }
 0x2f7   : > { %v3451_v19 = vpop.f32.mrf.mxu0  ;;  %2741 = vmatmul.mubr.f32.vlgmr.msra.gmra.mxu1 %v1740_v18 }
 0x2f8   : > { %v1710_v20 = vsub.f32 %v3451_v19, %v3441_v13 }
 0x2f9   : > { %v3455_v21 = vpop.f32.mrf.mxu0 }
 0x2fa   : > { %v1709_v22 = vsub.f32 %v3455_v21, %v3441_v13  ;;  %v1742_v23 = vmul.f32 %v1710_v20, %v1710_v20 }
 0x2fc   : > { %v1741_v40 = vmul.f32 %v1709_v22, %v1709_v22 }
 0x2fe   : > { %2743 = vmatprep.mubr.f32.mxu1 %v1741_v40 }
 0x2ff   : > { %v3459_v24 = vpop.f32.mrf.mxu0  ;;  %2744 = vmatmul.mubr.f32.gmra.mxu1 %v1742_v23 }
 0x300   : > { %v1712_v48 = vsub.f32 %v3459_v24, %v3441_v13 }
 0x301   : > { %v3463_v25 = vpop.f32.mrf.mxu0 }
 0x302   : > { %v1711_v26 = vsub.f32 %v3463_v25, %v3441_v13  ;;  %v1744_v28 = vmul.f32 %v1712_v48, %v1712_v48 }
 0x304   : > { %v1743_v27 = vmul.f32 %v1711_v26, %v1711_v26 }
 0x306   : > { %2746 = vmatprep.mubr.f32.mxu1 %v1743_v27 }
 0x307   : > { %v3467_v29 = vpop.f32.mrf.mxu0  ;;  %2747 = vmatmul.mubr.f32.gmra.mxu1 %v1744_v28 }
 0x308   : > { %v1714_v30 = vsub.f32 %v3467_v29, %v3441_v13 }
 0x309   : > { %v3471_v31 = vpop.f32.mrf.mxu0 }
 0x30a   : > { %v1713_v32 = vsub.f32 %v3471_v31, %v3441_v13  ;;  %v1746_v34 = vmul.f32 %v1714_v30, %v1714_v30 }
 0x30c   : > { %v1745_v33 = vmul.f32 %v1713_v32, %v1713_v32 }
 0x30e   : > { %2749 = vmatprep.mubr.f32.mxu1 %v1745_v33 }
 0x30f   : > { %v3475_v35 = vpop.f32.mrf.mxu0  ;;  %2750 = vmatmul.mubr.f32.gmra.mxu1 %v1746_v34 }
 0x310   : > { %v1716_v36 = vsub.f32 %v3475_v35, %v3441_v13 }
 0x311   : > { %v3479_v37 = vpop.f32.mrf.mxu0 }
 0x312   : > { %v1715_v38 = vsub.f32 %v3479_v37, %v3441_v13  ;;  %v1748_v42 = vmul.f32 %v1716_v36, %v1716_v36 }
 0x314   : > { %v1747_v39 = vmul.f32 %v1715_v38, %v1715_v38 }
 0x316   : > { %2752 = vmatprep.mubr.f32.mxu1 %v1747_v39 }
 0x317   : > { %v3483_v43 = vpop.f32.mrf.mxu0  ;;  %2753 = vmatmul.mubr.f32.gmra.mxu1 %v1748_v42 }
 0x318   : > { %v1718_v44 = vsub.f32 %v3483_v43, %v3441_v13 }
 0x319   : > { %v3487_v45 = vpop.f32.mrf.mxu0 }
 0x31a   : > { %v1717_v46 = vsub.f32 %v3487_v45, %v3441_v13  ;;  %v1750_v49 = vmul.f32 %v1718_v44, %v1718_v44 }
 0x31c   : > { %v1749_v47 = vmul.f32 %v1717_v46, %v1717_v46 }
 0x31e   : > { %2755 = vmatprep.mubr.f32.mxu1 %v1749_v47 }
 0x31f   : > { %v3491_v50 = vpop.f32.mrf.mxu0  ;;  %2756 = vmatmul.mubr.f32.gmra.mxu1 %v1750_v49 }
 0x320   : > { %v1720_v51 = vsub.f32 %v3491_v50, %v3441_v13 }
 0x321   : > { %v3495_v52 = vpop.f32.mrf.mxu0 }
 0x322   : > { %v1719_v53 = vsub.f32 %v3495_v52, %v3441_v13  ;;  %v1752_v55 = vmul.f32 %v1720_v51, %v1720_v51 }
 0x324   : > { %v1751_v54 = vmul.f32 %v1719_v53, %v1719_v53 }
 0x326   : > { %2758 = vmatprep.mubr.f32.mxu1 %v1751_v54 }
 0x327   : > { %v3499_v56 = vpop.f32.mrf.mxu0  ;;  %2759 = vmatmul.mubr.f32.gmra.mxu1 %v1752_v55 }
 0x328   : > { %v1722_v57 = vsub.f32 %v3499_v56, %v3441_v13 }
 0x329   : > { %v3503_v58 = vpop.f32.mrf.mxu0 }
 0x32a   : > { %v1721_v59 = vsub.f32 %v3503_v58, %v3441_v13  ;;  %v1754_v61 = vmul.f32 %v1722_v57, %v1722_v57 }
 0x32c   : > { %v1753_v60 = vmul.f32 %v1721_v59, %v1721_v59 }
 0x32e   : > { %2761 = vmatprep.mubr.f32.mxu1 %v1753_v60 }
 0x32f   : > { %v3507_v62 = vpop.f32.mrf.mxu0  ;;  %2762 = vmatmul.mubr.f32.gmra.mxu1 %v1754_v61 }
 0x330   : > { %v1724_v41 = vsub.f32 %v3507_v62, %v3441_v13 }
 0x331   : > { %v3511_v0 = vpop.f32.mrf.mxu0 }
 0x332   : > { %v1723_v1 = vsub.f32 %v3511_v0, %v3441_v13  ;;  %v1756_v3 = vmul.f32 %v1724_v41, %v1724_v41 }
 0x334   : > { %v1755_v2 = vmul.f32 %v1723_v1, %v1723_v1 }
 0x336   : > { %2764 = vmatprep.mubr.f32.mxu1 %v1755_v2 }
 0x337   : > { %v3515_v4 = vpop.f32.mrf.mxu0  ;;  %2765 = vmatmul.mubr.f32.gmra.mxu1 %v1756_v3 }
 0x338   : > { %v1726_v5 = vsub.f32 %v3515_v4, %v3441_v13 }
 0x339   : > { %v3519_v6 = vpop.f32.mrf.mxu0 }
 0x33a   : > { %v1725_v7 = vsub.f32 %v3519_v6, %v3441_v13  ;;  %v1758_v9 = vmul.f32 %v1726_v5, %v1726_v5 }
 0x33c   : > { %v1757_v8 = vmul.f32 %v1725_v7, %v1725_v7 }
 0x33e   : > { %2767 = vmatprep.mubr.f32.mxu1 %v1757_v8 }
 0x33f   : > { %v3523_v10 = vpop.f32.mrf.mxu0  ;;  %2768 = vmatmul.mubr.f32.gmra.mxu1 %v1758_v9 }
 0x340   : > { %v1728_v11 = vsub.f32 %v3523_v10, %v3441_v13 }
 0x341   : > { %v3527_v12 = vpop.f32.mrf.mxu0 }
 0x342   : > { %v1727_v15 = vsub.f32 %v3527_v12, %v3441_v13  ;;  %v1760_v63 = vmul.f32 %v1728_v11, %v1728_v11 }
 0x344   : > { %v1759_v17 = vmul.f32 %v1727_v15, %v1727_v15 }
 0x346   : > { %2770 = vmatprep.mubr.f32.mxu1 %v1759_v17 }
 0x347   : > { %v3531_v18 = vpop.f32.mrf.mxu0  ;;  %2771 = vmatmul.mubr.f32.gmra.mxu1 %v1760_v63 }
 0x348   : > { %v1730_v20 = vsub.f32 %v3531_v18, %v3441_v13 }
 0x349   : > { %v3535_v22 = vpop.f32.mrf.mxu0 }
 0x34a   : > { %v1729_v40 = vsub.f32 %v3535_v22, %v3441_v13  ;;  %v1762_v48 = vmul.f32 %v1730_v20, %v1730_v20  ;;  %v3575_v20 = vld [vmem:[%s3730_s2 + $0x6] ss:$0 sm:$0xff] }
 0x34c   : > { %v1761_v23 = vmul.f32 %v1729_v40, %v1729_v40 }
 0x34e   : > { %2773 = vmatprep.mubr.f32.mxu1 %v1761_v23 }
 0x34f   : > { %v3539_v26 = vpop.f32.mrf.mxu0  ;;  %2774 = vmatmul.mubr.f32.gmra.mxu1 %v1762_v48 }
 0x350   : > { %v1732_v27 = vsub.f32 %v3539_v26, %v3441_v13 }
 0x351   : > { %v3543_v28 = vpop.f32.mrf.mxu0 }
 0x352   : > { %v1731_v30 = vsub.f32 %v3543_v28, %v3441_v13  ;;  %v1764_v33 = vmul.f32 %v1732_v27, %v1732_v27 }
 0x354   : > { %v1763_v32 = vmul.f32 %v1731_v30, %v1731_v30 }
 0x356   : > { %2776 = vmatprep.mubr.f32.mxu1 %v1763_v32 }
 0x357   : > { %v3547_v34 = vpop.f32.mrf.mxu0  ;;  %2777 = vmatmul.mubr.f32.gmra.mxu1 %v1764_v33 }
 0x358   : > { %v1734_v36 = vsub.f32 %v3547_v34, %v3441_v13 }
 0x359   : > { %v3551_v38 = vpop.f32.mrf.mxu0 }
 0x35a   : > { %v1733_v39 = vsub.f32 %v3551_v38, %v3441_v13  ;;  %v1766_v44 = vmul.f32 %v1734_v36, %v1734_v36 }
 0x35c   : > { %v1765_v42 = vmul.f32 %v1733_v39, %v1733_v39 }
 0x35e   : > { %2779 = vmatprep.mubr.f32.mxu1 %v1765_v42 }
 0x35f   : > { %v3555_v46 = vpop.f32.mrf.mxu0  ;;  %2780 = vmatmul.mubr.f32.gmra.mxu1 %v1766_v44 }
 0x360   : > { %v1736_v47 = vsub.f32 %v3555_v46, %v3441_v13 }
 0x361   : > { %v3559_v49 = vpop.f32.mrf.mxu0 }
 0x362   : > { %v1735_v51 = vsub.f32 %v3559_v49, %v3441_v13  ;;  %v1768_v54 = vmul.f32 %v1736_v47, %v1736_v47 }
 0x364   : > { %v1767_v53 = vmul.f32 %v1735_v51, %v1735_v51 }
 0x366   : > { %2782 = vmatprep.mubr.f32.mxu1 %v1767_v53 }
 0x367   : > { %v3563_v55 = vpop.f32.mrf.mxu0  ;;  %2783 = vmatmul.mubr.f32.gmra.mxu1 %v1768_v54 }
 0x368   : > { %v1738_v57 = vsub.f32 %v3563_v55, %v3441_v13 }
 0x369   : > { %v3567_v59 = vpop.f32.mrf.mxu0 }
 0x36a   : > { %v1737_v60 = vsub.f32 %v3567_v59, %v3441_v13  ;;  %v1770_v41 = vmul.f32 %v1738_v57, %v1738_v57 }
 0x36c   : > { %v1769_v61 = vmul.f32 %v1737_v60, %v1737_v60 }
 0x36e   : > { %2785 = vmatprep.mubr.f32.mxu1 %v1769_v61 }
 0x36f   : > { %2786 = vmatmul.mubr.f32.gmra.mxu1 %v1770_v41 }
 0x3b7   : > { %v2742_v1 = vpop.f32.mrf.mxu1 }
 0x3b8   : > { %v1997_v2 = vmul.f32 -5.5555553, %v2742_v1 }
 0x3b9   : > { %v1837_v3 = vpop.f32.mrf.mxu1 }
 0x3ba   : > { %v2030_v5 = vmul.f32 1.442695, %v1997_v2  ;;  %v1996_v7 = vmul.f32 -5.5555553, %v1837_v3 }
 0x3bc   : > { %2836 = vpow2.f32 %v2030_v5  ;;  %v2028_v8 = vmul.f32 1.442695, %v1996_v7 }
 0x3be   : > { %2838 = vpow2.f32 %v2028_v8 }
 0x3bf   : > { %v2745_v9 = vpop.f32.mrf.mxu1 }
 0x3c0   : > { %v1999_v11 = vmul.f32 -5.5555553, %v2745_v9 }
 0x3c1   : > { %v1847_v15 = vpop.f32.mrf.mxu1 }
 0x3c2   : > { %v2034_v17 = vmul.f32 1.442695, %v1999_v11  ;;  %v1998_v63 = vmul.f32 -5.5555553, %v1847_v15 }
 0x3c4   : > { %2840 = vpow2.f32 %v2034_v17  ;;  %v2032_v13 = vmul.f32 1.442695, %v1998_v63 }
 0x3c6   : > { %2842 = vpow2.f32 %v2032_v13 }
 0x3c7   : > { %v2748_v40 = vpop.f32.mrf.mxu1 }
 0x3c8   : > { %v2001_v23 = vmul.f32 -5.5555553, %v2748_v40 }
 0x3c9   : > { %v2837_v48 = vpop.eup %2836  ;;  %v1857_v27 = vpop.f32.mrf.mxu1 }
 0x3ca   : > { %v2097_v30 = vmul.f32 %v2837_v48, %v3575_v20  ;;  %v2038_v32 = vmul.f32 1.442695, %v2001_v23  ;;  %v2000_v33 = vmul.f32 -5.5555553, %v1857_v27 }
 0x3cb   : > { %v2839_v36 = vpop.eup %2838 }
 0x3cc   : > { %v2129_v39 = vadd.f32 %v3443_v14, %v2097_v30  ;;  %v2096_v42 = vmul.f32 %v2839_v36, %v3575_v20  ;;  %2844 = vpow2.f32 %v2038_v32  ;;  %v2036_v44 = vmul.f32 1.442695, %v2000_v33 }
 0x3ce   : > { %2161 = vst [vmem:[%s3582_s29 + $0x8] sm:$0xff] %v2129_v39  ;;  %v2128_v47 = vadd.f32 %v2096_v42, %v3447_v16  ;;  %2846 = vpow2.f32 %v2036_v44 }
 0x3cf   : > { %v2751_v51 = vpop.f32.mrf.mxu1 }
 0x3d0   : > { %2160 = vst [vmem:[%s3582_s29] sm:$0xff] %v2128_v47  ;;  %v2003_v53 = vmul.f32 -5.5555553, %v2751_v51 }
 0x3d1   : > { %v2841_v54 = vpop.eup %2840  ;;  %v1867_v57 = vpop.f32.mrf.mxu1 }
 0x3d2   : > { %v2099_v14 = vmul.f32 %v2841_v54, %v3575_v20  ;;  %v2042_v60 = vmul.f32 1.442695, %v2003_v53  ;;  %v2002_v61 = vmul.f32 -5.5555553, %v1867_v57 }
 0x3d3   : > { %v2843_v41 = vpop.eup %2842 }
 0x3d4   : > { %v2131_v1 = vadd.f32 %v3451_v19, %v2099_v14  ;;  %v2098_v2 = vmul.f32 %v2843_v41, %v3575_v20  ;;  %2848 = vpow2.f32 %v2042_v60  ;;  %v2040_v3 = vmul.f32 1.442695, %v2002_v61 }
 0x3d6   : > { %2163 = vst [vmem:[%s3582_s29 + $0x18] sm:$0xff] %v2131_v1  ;;  %v2130_v16 = vadd.f32 %v2098_v2, %v3455_v21  ;;  %2850 = vpow2.f32 %v2040_v3 }
 0x3d7   : > { %v2754_v5 = vpop.f32.mrf.mxu1 }
 0x3d8   : > { %2162 = vst [vmem:[%s3582_s29 + $0x10] sm:$0xff] %v2130_v16  ;;  %v2005_v7 = vmul.f32 -5.5555553, %v2754_v5 }
 0x3d9   : > { %v2845_v8 = vpop.eup %2844  ;;  %v1877_v9 = vpop.f32.mrf.mxu1 }
 0x3da   : > { %v2101_v11 = vmul.f32 %v2845_v8, %v3575_v20  ;;  %v2046_v15 = vmul.f32 1.442695, %v2005_v7  ;;  %v2004_v17 = vmul.f32 -5.5555553, %v1877_v9 }
 0x3db   : > { %v2847_v19 = vpop.eup %2846 }
 0x3dc   : > { %v2133_v63 = vadd.f32 %v3459_v24, %v2101_v11  ;;  %v2100_v13 = vmul.f32 %v2847_v19, %v3575_v20  ;;  %2852 = vpow2.f32 %v2046_v15  ;;  %v2044_v40 = vmul.f32 1.442695, %v2004_v17 }
 0x3de   : > { %2165 = vst [vmem:[%s3582_s29 + $0x28] sm:$0xff] %v2133_v63  ;;  %v2132_v21 = vadd.f32 %v2100_v13, %v3463_v25  ;;  %2854 = vpow2.f32 %v2044_v40 }
 0x3df   : > { %v2757_v23 = vpop.f32.mrf.mxu1 }
 0x3e0   : > { %2164 = vst [vmem:[%s3582_s29 + $0x20] sm:$0xff] %v2132_v21  ;;  %v2007_v48 = vmul.f32 -5.5555553, %v2757_v23 }
 0x3e1   : > { %v2849_v27 = vpop.eup %2848  ;;  %v1887_v30 = vpop.f32.mrf.mxu1 }
 0x3e2   : > { %v2103_v32 = vmul.f32 %v2849_v27, %v3575_v20  ;;  %v2050_v33 = vmul.f32 1.442695, %v2007_v48  ;;  %v2006_v36 = vmul.f32 -5.5555553, %v1887_v30 }
 0x3e3   : > { %v2851_v24 = vpop.eup %2850 }
 0x3e4   : > { %v2135_v39 = vadd.f32 %v3467_v29, %v2103_v32  ;;  %v2102_v42 = vmul.f32 %v2851_v24, %v3575_v20  ;;  %2856 = vpow2.f32 %v2050_v33  ;;  %v2048_v44 = vmul.f32 1.442695, %v2006_v36 }
 0x3e6   : > { %2167 = vst [vmem:[%s3582_s29 + $0x38] sm:$0xff] %v2135_v39  ;;  %v2134_v25 = vadd.f32 %v2102_v42, %v3471_v31  ;;  %2858 = vpow2.f32 %v2048_v44 }
 0x3e7   : > { %v2760_v47 = vpop.f32.mrf.mxu1 }
 0x3e8   : > { %2166 = vst [vmem:[%s3582_s29 + $0x30] sm:$0xff] %v2134_v25  ;;  %v2009_v51 = vmul.f32 -5.5555553, %v2760_v47 }
 0x3e9   : > { %v2853_v53 = vpop.eup %2852  ;;  %v1897_v54 = vpop.f32.mrf.mxu1 }
 0x3ea   : > { %v2105_v57 = vmul.f32 %v2853_v53, %v3575_v20  ;;  %v2054_v14 = vmul.f32 1.442695, %v2009_v51  ;;  %v2008_v60 = vmul.f32 -5.5555553, %v1897_v54 }
 0x3eb   : > { %v2855_v29 = vpop.eup %2854 }
 0x3ec   : > { %v2137_v61 = vadd.f32 %v3475_v35, %v2105_v57  ;;  %v2104_v41 = vmul.f32 %v2855_v29, %v3575_v20  ;;  %2860 = vpow2.f32 %v2054_v14  ;;  %v2052_v1 = vmul.f32 1.442695, %v2008_v60 }
 0x3ee   : > { %2169 = vst [vmem:[%s3582_s29 + $0x48] sm:$0xff] %v2137_v61  ;;  %v2136_v31 = vadd.f32 %v2104_v41, %v3479_v37  ;;  %2862 = vpow2.f32 %v2052_v1 }
 0x3ef   : > { %v2763_v2 = vpop.f32.mrf.mxu1 }
 0x3f0   : > { %2168 = vst [vmem:[%s3582_s29 + $0x40] sm:$0xff] %v2136_v31  ;;  %v2011_v3 = vmul.f32 -5.5555553, %v2763_v2 }
 0x3f1   : > { %v2857_v16 = vpop.eup %2856  ;;  %v1907_v5 = vpop.f32.mrf.mxu1 }
 0x3f2   : > { %v2107_v7 = vmul.f32 %v2857_v16, %v3575_v20  ;;  %v2058_v8 = vmul.f32 1.442695, %v2011_v3  ;;  %v2010_v9 = vmul.f32 -5.5555553, %v1907_v5 }
 0x3f3   : > { %v2859_v35 = vpop.eup %2858 }
 0x3f4   : > { %v2139_v11 = vadd.f32 %v3483_v43, %v2107_v7  ;;  %v2106_v15 = vmul.f32 %v2859_v35, %v3575_v20  ;;  %2864 = vpow2.f32 %v2058_v8  ;;  %v2056_v17 = vmul.f32 1.442695, %v2010_v9 }
 0x3f6   : > { %2171 = vst [vmem:[%s3582_s29 + $0x58] sm:$0xff] %v2139_v11  ;;  %v2138_v37 = vadd.f32 %v2106_v15, %v3487_v45  ;;  %2866 = vpow2.f32 %v2056_v17 }
 0x3f7   : > { %v2766_v19 = vpop.f32.mrf.mxu1 }
 0x3f8   : > { %2170 = vst [vmem:[%s3582_s29 + $0x50] sm:$0xff] %v2138_v37  ;;  %v2013_v63 = vmul.f32 -5.5555553, %v2766_v19 }
 0x3f9   : > { %v2861_v13 = vpop.eup %2860  ;;  %v1917_v40 = vpop.f32.mrf.mxu1 }
 0x3fa   : > { %v2109_v21 = vmul.f32 %v2861_v13, %v3575_v20  ;;  %v2062_v23 = vmul.f32 1.442695, %v2013_v63  ;;  %v2012_v48 = vmul.f32 -5.5555553, %v1917_v40 }
 0x3fb   : > { %v2863_v43 = vpop.eup %2862 }
 0x3fc   : > { %v2141_v27 = vadd.f32 %v3491_v50, %v2109_v21  ;;  %v2108_v30 = vmul.f32 %v2863_v43, %v3575_v20  ;;  %2868 = vpow2.f32 %v2062_v23  ;;  %v2060_v32 = vmul.f32 1.442695, %v2012_v48 }
 0x3fe   : > { %2173 = vst [vmem:[%s3582_s29 + $0x68] sm:$0xff] %v2141_v27  ;;  %v2140_v45 = vadd.f32 %v2108_v30, %v3495_v52  ;;  %2870 = vpow2.f32 %v2060_v32 }
 0x3ff   : > { %v2769_v33 = vpop.f32.mrf.mxu1 }
 0x400   : > { %2172 = vst [vmem:[%s3582_s29 + $0x60] sm:$0xff] %v2140_v45  ;;  %v2015_v36 = vmul.f32 -5.5555553, %v2769_v33 }
 0x401   : > { %v2865_v24 = vpop.eup %2864  ;;  %v1927_v39 = vpop.f32.mrf.mxu1 }
 0x402   : > { %v2111_v42 = vmul.f32 %v2865_v24, %v3575_v20  ;;  %v2066_v44 = vmul.f32 1.442695, %v2015_v36  ;;  %v2014_v25 = vmul.f32 -5.5555553, %v1927_v39 }
 0x403   : > { %v2867_v50 = vpop.eup %2866 }
 0x404   : > { %v2143_v47 = vadd.f32 %v3499_v56, %v2111_v42  ;;  %v2110_v51 = vmul.f32 %v2867_v50, %v3575_v20  ;;  %2872 = vpow2.f32 %v2066_v44  ;;  %v2064_v53 = vmul.f32 1.442695, %v2014_v25 }
 0x406   : > { %2175 = vst [vmem:[%s3582_s29 + $0x78] sm:$0xff] %v2143_v47  ;;  %v2142_v52 = vadd.f32 %v2110_v51, %v3503_v58  ;;  %2874 = vpow2.f32 %v2064_v53 }
 0x407   : > { %v2772_v54 = vpop.f32.mrf.mxu1 }
 0x408   : > { %2174 = vst [vmem:[%s3582_s29 + $0x70] sm:$0xff] %v2142_v52  ;;  %v2017_v57 = vmul.f32 -5.5555553, %v2772_v54 }
 0x409   : > { %v2869_v14 = vpop.eup %2868  ;;  %v1937_v60 = vpop.f32.mrf.mxu1 }
 0x40a   : > { %v2113_v29 = vmul.f32 %v2869_v14, %v3575_v20  ;;  %v2070_v61 = vmul.f32 1.442695, %v2017_v57  ;;  %v2016_v41 = vmul.f32 -5.5555553, %v1937_v60 }
 0x40b   : > { %v2871_v56 = vpop.eup %2870 }
 0x40c   : > { %v2145_v1 = vadd.f32 %v3507_v62, %v2113_v29  ;;  %v2112_v31 = vmul.f32 %v2871_v56, %v3575_v20  ;;  %2876 = vpow2.f32 %v2070_v61  ;;  %v2068_v2 = vmul.f32 1.442695, %v2016_v41 }
 0x40e   : > { %2177 = vst [vmem:[%s3582_s29 + $0x88] sm:$0xff] %v2145_v1  ;;  %v2144_v58 = vadd.f32 %v2112_v31, %v3511_v0  ;;  %2878 = vpow2.f32 %v2068_v2 }
 0x40f   : > { %v2775_v3 = vpop.f32.mrf.mxu1 }
 0x410   : > { %2176 = vst [vmem:[%s3582_s29 + $0x80] sm:$0xff] %v2144_v58  ;;  %v2019_v16 = vmul.f32 -5.5555553, %v2775_v3 }
 0x411   : > { %v2873_v5 = vpop.eup %2872  ;;  %v1947_v7 = vpop.f32.mrf.mxu1 }
 0x412   : > { %v2115_v8 = vmul.f32 %v2873_v5, %v3575_v20  ;;  %v2074_v9 = vmul.f32 1.442695, %v2019_v16  ;;  %v2018_v35 = vmul.f32 -5.5555553, %v1947_v7 }
 0x413   : > { %v2875_v62 = vpop.eup %2874 }
 0x414   : > { %v2147_v11 = vadd.f32 %v3515_v4, %v2115_v8  ;;  %v2114_v15 = vmul.f32 %v2875_v62, %v3575_v20  ;;  %2880 = vpow2.f32 %v2074_v9  ;;  %v2072_v17 = vmul.f32 1.442695, %v2018_v35 }
 0x416   : > { %2179 = vst [vmem:[%s3582_s29 + $0x98] sm:$0xff] %v2147_v11  ;;  %v2146_v0 = vadd.f32 %v2114_v15, %v3519_v6  ;;  %2882 = vpow2.f32 %v2072_v17 }
 0x417   : > { %v2778_v37 = vpop.f32.mrf.mxu1 }
 0x418   : > { %2178 = vst [vmem:[%s3582_s29 + $0x90] sm:$0xff] %v2146_v0  ;;  %v2021_v19 = vmul.f32 -5.5555553, %v2778_v37 }
 0x419   : > { %v2877_v63 = vpop.eup %2876  ;;  %v1957_v13 = vpop.f32.mrf.mxu1 }
 0x41a   : > { %v2117_v40 = vmul.f32 %v2877_v63, %v3575_v20  ;;  %v2078_v21 = vmul.f32 1.442695, %v2021_v19  ;;  %v2020_v23 = vmul.f32 -5.5555553, %v1957_v13 }
 0x41b   : > { %v2879_v4 = vpop.eup %2878 }
 0x41c   : > { %v2149_v48 = vadd.f32 %v3523_v10, %v2117_v40  ;;  %v2116_v43 = vmul.f32 %v2879_v4, %v3575_v20  ;;  %2884 = vpow2.f32 %v2078_v21  ;;  %v2076_v27 = vmul.f32 1.442695, %v2020_v23 }
 0x41e   : > { %2181 = vst [vmem:[%s3582_s29 + $0xa8] sm:$0xff] %v2149_v48  ;;  %v2148_v6 = vadd.f32 %v2116_v43, %v3527_v12  ;;  %2886 = vpow2.f32 %v2076_v27 }
 0x41f   : > { %v2781_v30 = vpop.f32.mrf.mxu1 }
 0x420   : > { %2180 = vst [vmem:[%s3582_s29 + $0xa0] sm:$0xff] %v2148_v6  ;;  %v2023_v32 = vmul.f32 -5.5555553, %v2781_v30 }
 0x421   : > { %v2881_v45 = vpop.eup %2880  ;;  %v1967_v33 = vpop.f32.mrf.mxu1 }
 0x422   : > { %v2119_v36 = vmul.f32 %v2881_v45, %v3575_v20  ;;  %v2082_v24 = vmul.f32 1.442695, %v2023_v32  ;;  %v2022_v39 = vmul.f32 -5.5555553, %v1967_v33 }
 0x423   : > { %v2883_v10 = vpop.eup %2882 }
 0x424   : > { %v2151_v42 = vadd.f32 %v3531_v18, %v2119_v36  ;;  %v2118_v44 = vmul.f32 %v2883_v10, %v3575_v20  ;;  %2888 = vpow2.f32 %v2082_v24  ;;  %v2080_v25 = vmul.f32 1.442695, %v2022_v39 }
 0x426   : > { %2183 = vst [vmem:[%s3582_s29 + $0xb8] sm:$0xff] %v2151_v42  ;;  %v2150_v12 = vadd.f32 %v2118_v44, %v3535_v22  ;;  %2890 = vpow2.f32 %v2080_v25 }
 0x427   : > { %v2784_v50 = vpop.f32.mrf.mxu1 }
 0x428   : > { %2182 = vst [vmem:[%s3582_s29 + $0xb0] sm:$0xff] %v2150_v12  ;;  %v2025_v47 = vmul.f32 -5.5555553, %v2784_v50 }
 0x429   : > { %v2885_v51 = vpop.eup %2884  ;;  %v1977_v53 = vpop.f32.mrf.mxu1 }
 0x42a   : > { %v2121_v52 = vmul.f32 %v2885_v51, %v3575_v20  ;;  %v2086_v54 = vmul.f32 1.442695, %v2025_v47  ;;  %v2024_v57 = vmul.f32 -5.5555553, %v1977_v53 }
 0x42b   : > { %v2887_v18 = vpop.eup %2886 }
 0x42c   : > { %v2153_v14 = vadd.f32 %v3539_v26, %v2121_v52  ;;  %v2120_v60 = vmul.f32 %v2887_v18, %v3575_v20  ;;  %2892 = vpow2.f32 %v2086_v54  ;;  %v2084_v29 = vmul.f32 1.442695, %v2024_v57 }
 0x42e   : > { %2185 = vst [vmem:[%s3582_s29 + $0xc8] sm:$0xff] %v2153_v14  ;;  %v2152_v22 = vadd.f32 %v2120_v60, %v3543_v28  ;;  %2894 = vpow2.f32 %v2084_v29 }
 0x42f   : > { %v2787_v61 = vpop.f32.mrf.mxu1 }
 0x430   : > { %2184 = vst [vmem:[%s3582_s29 + $0xc0] sm:$0xff] %v2152_v22  ;;  %v2027_v41 = vmul.f32 -5.5555553, %v2787_v61 }
 0x431   : > { %v2889_v56 = vpop.eup %2888  ;;  %v1987_v1 = vpop.f32.mrf.mxu1 }
 0x432   : > { %v2123_v31 = vmul.f32 %v2889_v56, %v3575_v20  ;;  %v2090_v2 = vmul.f32 1.442695, %v2027_v41  ;;  %v2026_v26 = vmul.f32 -5.5555553, %v1987_v1 }
 0x433   : > { %v2891_v58 = vpop.eup %2890 }
 0x434   : > { %v2155_v3 = vadd.f32 %v3547_v34, %v2123_v31  ;;  %v2122_v16 = vmul.f32 %v2891_v58, %v3575_v20  ;;  %2896 = vpow2.f32 %v2090_v2  ;;  %v2088_v28 = vmul.f32 1.442695, %v2026_v26 }
 0x436   : > { %2187 = vst [vmem:[%s3582_s29 + $0xd8] sm:$0xff] %v2155_v3  ;;  %v2154_v5 = vadd.f32 %v2122_v16, %v3551_v38  ;;  %2898 = vpow2.f32 %v2088_v28 }
 0x438   : > { %2186 = vst [vmem:[%s3582_s29 + $0xd0] sm:$0xff] %v2154_v5 }
 0x439   : > { %v2893_v7 = vpop.eup %2892 }
 0x43a   : > { %v2125_v8 = vmul.f32 %v2893_v7, %v3575_v20 }
 0x43b   : > { %v2895_v9 = vpop.eup %2894 }
 0x43c   : > { %v2157_v35 = vadd.f32 %v3555_v46, %v2125_v8  ;;  %v2124_v34 = vmul.f32 %v2895_v9, %v3575_v20 }
 0x43e   : > { %2189 = vst [vmem:[%s3582_s29 + $0xe8] sm:$0xff] %v2157_v35  ;;  %v2156_v62 = vadd.f32 %v2124_v34, %v3559_v49 }
 0x440   : > { %2188 = vst [vmem:[%s3582_s29 + $0xe0] sm:$0xff] %v2156_v62 }
 0x441   : > { %v2897_v11 = vpop.eup %2896 }
 0x442   : > { %v2127_v38 = vmul.f32 %v2897_v11, %v3575_v20 }
 0x443   : > { %v2899_v15 = vpop.eup %2898 }
 0x444   : > { %v2159_v17 = vadd.f32 %v3563_v55, %v2127_v38  ;;  %v2126_v0 = vmul.f32 %v2899_v15, %v3575_v20 }
 0x446   : > { %2191 = vst [vmem:[%s3582_s29 + $0xf8] sm:$0xff] %v2159_v17  ;;  %v2158_v46 = vadd.f32 %v2126_v0, %v3567_v59 }
 0x448   : > { %2190 = vst [vmem:[%s3582_s29 + $0xf0] sm:$0xff] %v2158_v46 }
 0x449   : > { %2913 = shalt.err (!%p2910_p3)
}
 0x44a   : > { %s2914_s17 = scalar_lea.hbm %s3679_s7, 4096  ;;  %s2918_s24 = scalar_lea.hbm %s3731_s3, 8192 }
 0x44b   : > { %p2915_p4 = scmp.ne.s32.totalorder %s3679_s7, %s2914_s17  ;;  %p2919_p9 = scmp.lt.s32.totalorder %s3679_s7, %s3731_s3 }
 0x44c   : > { %p2920_p10 = scmp.lt.s32.totalorder %s2918_s24, %s2914_s17 }
 0x44d   : > { %p2916_p7 = pnand %p2915_p4, %p3025_p5 }
 0x44e   : > { %p2921_p11 = por %p2920_p10, %p2919_p9 }
 0x44f   : > { %p2917_p8 = pneg %p2916_p7 }
 0x451   : > { %p2922_p12 = pnand %p2921_p11, %p2917_p8 }
 0x453   : > { %2925 = shalt.err (!%p2922_p12)
}
 0x454   : > { %s2965_s27 = smov 128   ;;  %s2966_s28 = smov 8  }
 0x455   : > { %2788 = dma.vmem_to_hbm [thread:$0]  (%p3025_p5), %s3681_s4, 4096, %s3679_s7, %s3688_s16, %s2965_s27, %s2965_s27, %s2966_s28  }
 0x456 PF: > { %p2794_p13 = scmp.ge.s32.totalorder %s2960_s15, 2  ;;  %s2221_s29 = sand.u32 1, %s2948_s12  }
 0x457   : > { %s2222_s30 = scalar_lea.sflag [#allocation3], %s2221_s29 }
 0x458   : > { %p2791_p0 = pnand %p2794_p13, %p3029_p6 }
 0x45a   : > { %p2792_p1 = pneg %p2791_p0 }
 0x45c   : > { %2943 = dma.done.wait (%p2792_p1), %s2222_s30, 4096  }
 0x45d   : > { %2945 = vsyncadd (%p2792_p1), %s2222_s30, 4294963200  ;;  %p13_p2 = scmp.ge.s32.totalorder %s3012_s18, 4   ;;  %s3734_s12 = smov %s2952_s13 }
 0x45e   : > { %s3735_s13 = smov %s2956_s14  ;;  %s3736_s14 = smov %s3023_s21 }
 0x45f   : > { %s3737_s15 = smov %s3012_s18  ;;  %15 = sbr.rel (!%p13_p2) target bundleno = 3 (0x3), region = 67 }
 0x464   :  { %2227 = vsyncpa [#allocation3], 1 }
 0x465   :  { %2229 = vsyncpa [#allocation3 + $0x1], 1 }

</bundles_post_ra>
